<compile_context>
chip_gen: v5e
topology: v5e:2x2
jax: 0.10.0
libtpu: 0.0.40
codegen_flags: <defaults>
</compile_context>

<pallas_src>
import jax
import jax.numpy as jnp
from jax.experimental import pallas as pl
from jax.experimental.pallas import tpu as pltpu

# VMEM memory-space handle (new API: pltpu.MemorySpace.VMEM; older: pltpu.VMEM).
_VMEM = pltpu.MemorySpace.VMEM if hasattr(pltpu, "MemorySpace") else pltpu.VMEM

_LANE = 128
_BF16_TILE_ROWS = 16  # bf16 packs 2 rows/sublane -> keep packed row offsets % 16 == 0


def _rup(x, m):
    return ((x + m - 1) // m) * m


def _pad2d(x, rows, cols):
    r, c = x.shape
    return jnp.pad(x, ((0, rows - r), (0, cols - c)))


# ------------------------------------------------------- one-time prepare ---

def prepare_params(params):
    """One-time (out of the hot path): zero-pad every weight to a lane-dense
    shape, cast to bf16, and pack weights + bias into ONE contiguous buffer so
    the kernel prologue issues a single DMA for all parameters."""
    in_dim, h0 = params["w1"].shape
    h1 = params["w2"].shape[1]
    h2 = params["w3"].shape[1]
    out_dim = params["w_out"].shape[1]

    in_p, h0_p, h1_p, h2_p, out_p = (_rup(d, _LANE)
                                     for d in (in_dim, h0, h1, h2, out_dim))
    width = max(h0_p, h1_p, h2_p, out_p)

    blocks = [
        _pad2d(params["w1"], in_p, width),
        _pad2d(params["w2"], h0_p, width),
        _pad2d(params["w3"], h1_p, width),
        _pad2d(params["w_out"], h2_p, width),
        _pad2d(params["b_out"].reshape(1, -1), _BF16_TILE_ROWS, width),
    ]
    wpack = jnp.concatenate(blocks, axis=0).astype(jnp.bfloat16)

    layout = dict(
        in_dim=in_dim, out_dim=out_dim,
        in_p=in_p, h0_p=h0_p, h1_p=h1_p, h2_p=h2_p, out_p=out_p,
        r_w1=0,
        r_w2=in_p,
        r_w3=in_p + h0_p,
        r_wo=in_p + h0_p + h1_p,
        r_b=in_p + h0_p + h1_p + h2_p,
    )
    return jax.device_put(wpack), layout


def prepare_adj(adj):
    """One-time per graph: pad adjacency to a 128-multiple on both dims
    (lane-dense loads, unmasked MXU K passes) and cast to bf16."""
    n = adj.shape[0]
    n_p = _rup(n, _LANE)
    return jax.device_put(_pad2d(adj, n_p, n_p).astype(jnp.bfloat16))


# ---------------------------------------------------------------- kernel ----

def _make_kernel(layout):
    in_p, h0_p, h1_p, h2_p, out_p = (layout[k] for k in
                                     ("in_p", "h0_p", "h1_p", "h2_p", "out_p"))
    r1, r2, r3, r4, rb = (layout[k] for k in
                          ("r_w1", "r_w2", "r_w3", "r_wo", "r_b"))

    def kernel(x_ref, adj_ref, wp_ref, o_ref):
        """Whole GNNP forward in VMEM: 3x relu(adj @ X @ W) then relu(h Wo + b)."""
        f32, bf16 = jnp.float32, jnp.bfloat16

        # Layer 1 (in_f < out_f): (adj @ X) @ W1  ==  adj @ (X @ W1)
        ax = jnp.dot(adj_ref[...], x_ref[...], preferred_element_type=f32)
        h = jnp.maximum(
            jnp.dot(ax.astype(bf16), wp_ref[r1:r1 + in_p, 0:h0_p],
                    preferred_element_type=f32), 0.0)

        # Layer 2 (in_f < out_f): (adj @ h) @ W2
        ah = jnp.dot(adj_ref[...], h.astype(bf16), preferred_element_type=f32)
        h = jnp.maximum(
            jnp.dot(ah.astype(bf16), wp_ref[r2:r2 + h0_p, 0:h1_p],
                    preferred_element_type=f32), 0.0)

        # Layer 3 (in_f > out_f): adj @ (h @ W3)
        hw = jnp.dot(h.astype(bf16), wp_ref[r3:r3 + h1_p, 0:h2_p],
                     preferred_element_type=f32)
        h = jnp.maximum(
            jnp.dot(adj_ref[...], hw.astype(bf16), preferred_element_type=f32),
            0.0)

        # Output head: relu(h @ Wout + b)
        b = wp_ref[rb:rb + 1, 0:out_p].astype(f32)
        out = jnp.dot(h.astype(bf16), wp_ref[r4:r4 + h2_p, 0:out_p],
                      preferred_element_type=f32) + b
        o_ref[...] = jnp.maximum(out, 0.0).astype(o_ref.dtype)
        # TODO(synk): F.dropout(training=self.training) is a no-op at inference; omitted.

    return kernel


# --------------------------------------------------------------- wrapper ----

def make_gnnp_forward(layout):
    kernel = _make_kernel(layout)
    out_dim = layout["out_dim"]
    in_p, out_p = layout["in_p"], layout["out_p"]
    h0_p, h1_p, h2_p = layout["h0_p"], layout["h1_p"], layout["h2_p"]

    @jax.jit
    def forward(feat_x, adj_p, wpack):
        n = feat_x.shape[0]
        n_p = adj_p.shape[0]
        x_p = _pad2d(feat_x, n_p, in_p).astype(jnp.bfloat16)

        # Advisory cost estimate so XLA schedules around the custom call.
        flops = 2 * n_p * (n_p * in_p + in_p * h0_p + n_p * h0_p + h0_p * h1_p
                           + h1_p * h2_p + n_p * h2_p + h2_p * out_p)
        in_bytes = x_p.size * 2 + adj_p.size * 2 + wpack.size * 2
        out_bytes = n_p * out_p * 2
        cost = pl.CostEstimate(flops=flops, transcendentals=0,
                               bytes_accessed=in_bytes + out_bytes)

        # VMEM budget sized from actual operands + f32 intermediates, with
        # headroom (v5e's default scoped limit is only 16 MiB).
        inter_bytes = 2 * n_p * max(h0_p, h1_p, h2_p) * 4
        vmem_need = 2 * (in_bytes + out_bytes + inter_bytes) + (4 << 20)
        vmem_limit = int(min(100 << 20, max(vmem_need, 32 << 20)))

        spec = pl.BlockSpec(memory_space=_VMEM)
        out_padded = pl.pallas_call(
            kernel,
            out_shape=jax.ShapeDtypeStruct((n_p, out_p), jnp.bfloat16),
            in_specs=[spec, spec, spec],
            out_specs=spec,
            compiler_params=pltpu.CompilerParams(vmem_limit_bytes=vmem_limit),
            cost_estimate=cost,
        )(x_p, adj_p, wpack)
        return out_padded[:n, :out_dim]

    return forward


# -------------------------------------------------------------- reference ---

def ref_forward_f32(feat_x, adj, params):
    """Original (unpadded, full-f32) GNNP forward."""
    h = jnp.maximum(adj @ (feat_x @ params["w1"]), 0.0)
    h = jnp.maximum(adj @ (h @ params["w2"]), 0.0)
    h = jnp.maximum(adj @ (h @ params["w3"]), 0.0)
    return jnp.maximum(h @ params["w_out"] + params["b_out"], 0.0)


def ref_forward_matched(feat_x, adj_p, wpack, layout):
    """Plain-JAX reference with the exact same padded bf16 operands, packed
    weight slices, contraction order and bf16 output cast as the kernel."""
    bf, f32 = jnp.bfloat16, jnp.float32
    n = feat_x.shape[0]
    n_p = adj_p.shape[0]
    in_p, h0_p, h1_p, h2_p, out_p = (layout[k] for k in
                                     ("in_p", "h0_p", "h1_p", "h2_p", "out_p"))
    r1, r2, r3, r4, rb = (layout[k] for k in
                          ("r_w1", "r_w2", "r_w3", "r_wo", "r_b"))
    x_p = _pad2d(feat_x, n_p, in_p).astype(bf)
    w1 = wpack[r1:r1 + in_p, 0:h0_p]
    w2 = wpack[r2:r2 + h0_p, 0:h1_p]
    w3 = wpack[r3:r3 + h1_p, 0:h2_p]
    wo = wpack[r4:r4 + h2_p, 0:out_p]
    b = wpack[rb:rb + 1, 0:out_p].astype(f32)

    ax = jnp.dot(adj_p, x_p, preferred_element_type=f32)
    h = jnp.maximum(jnp.dot(ax.astype(bf), w1, preferred_element_type=f32), 0.0)
    ah = jnp.dot(adj_p, h.astype(bf), preferred_element_type=f32)
    h = jnp.maximum(jnp.dot(ah.astype(bf), w2, preferred_element_type=f32), 0.0)
    hw = jnp.dot(h.astype(bf), w3, preferred_element_type=f32)
    h = jnp.maximum(jnp.dot(adj_p, hw.astype(bf), preferred_element_type=f32), 0.0)
    out = jnp.maximum(jnp.dot(h.astype(bf), wo, preferred_element_type=f32) + b, 0.0)
    return out.astype(bf)[:n, :layout["out_dim"]]


# ----------------------------------------------------------- param init -----

def xavier_uniform(key, fan_in, fan_out):
    bound = jnp.sqrt(6.0 / (fan_in + fan_out))
    return jax.random.uniform(key, (fan_in, fan_out), jnp.float32, -bound, bound)


def init_params(key, in_dim, out_dim=100, hidden_dims=(200, 300, 150)):
    k1, k2, k3, k4, k5 = jax.random.split(key, 5)
    h0, h1, h2 = hidden_dims
    # nn.Linear default init ~ U(-1/sqrt(fan_in), 1/sqrt(fan_in)); weight stored as [in, out].
    lb = 1.0 / jnp.sqrt(jnp.float32(h2))
    return {
        "w1": xavier_uniform(k1, in_dim, h0),
        "w2": xavier_uniform(k2, h0, h1),
        "w3": xavier_uniform(k3, h1, h2),
        "w_out": jax.random.uniform(k4, (h2, out_dim), jnp.float32, -lb, lb),
        "b_out": jax.random.uniform(k5, (out_dim,), jnp.float32, -lb, lb),
    }


# ---------------------------------------------------------------- main ------

if __name__ == "__main__":
    key = jax.random.PRNGKey(0)
    k_feat, k_adj, k_params = jax.random.split(key, 3)

    N, IN_DIM, OUT_DIM = 16, 32, 100
    HIDDEN = (200, 300, 150)

    feat_x = jax.random.normal(k_feat, (N, IN_DIM), jnp.float32)
    # Dense (row-normalized) adjacency standing in for torch.spmm's sparse adj.
    adj_raw = jax.random.uniform(k_adj, (N, N), jnp.float32)
    adj = adj_raw / jnp.sum(adj_raw, axis=1, keepdims=True)

    params = init_params(k_params, IN_DIM, OUT_DIM, HIDDEN)

    # One-time (out of the hot path): pack/pad/cast weights + adjacency.
    wpack, layout = prepare_params(params)
    adj_p = prepare_adj(adj)
    gnnp_forward = make_gnnp_forward(layout)

    out = jax.block_until_ready(gnnp_forward(feat_x, adj_p, wpack))
    assert out.shape == (N, OUT_DIM)
    out_f32 = out.astype(jnp.float32)

    # Tight check vs a plain-JAX reference with identical bf16/padding numerics.
    ref_m = ref_forward_matched(feat_x, adj_p, wpack, layout).astype(jnp.float32)
    assert jnp.allclose(out_f32, ref_m, atol=1e-3, rtol=1e-3), float(
        jnp.max(jnp.abs(out_f32 - ref_m)))

    # Looser check vs the original full-f32 forward (bf16 rounding tolerance).
    ref = ref_forward_f32(feat_x, adj, params)
    assert jnp.allclose(out_f32, ref, atol=5e-2, rtol=5e-2), float(
        jnp.max(jnp.abs(out_f32 - ref)))

    print("KERNEL_OK")
</pallas_src>

<mosaic_0001>
module attributes {stable_mosaic.version = 11 : i64} {
  func.func @kernel(%arg0: memref<128x128xbf16, #tpu.memory_space<vmem>>, %arg1: memref<128x128xbf16, #tpu.memory_space<vmem>>, %arg2: memref<1040x384xbf16, #tpu.memory_space<vmem>>, %arg3: memref<128x128xbf16, #tpu.memory_space<vmem>>) attributes {dimension_semantics = [], scalar_prefetch = 0 : i64, scratch_operands = 0 : i64, tpu.core_type = #tpu.core_type<tc>} {
    %c0 = arith.constant 0 : index
    %c0_0 = arith.constant 0 : index
    %0 = vector.load %arg1[%c0, %c0_0] : memref<128x128xbf16, #tpu.memory_space<vmem>>, vector<128x128xbf16>
    %c0_1 = arith.constant 0 : index
    %c0_2 = arith.constant 0 : index
    %1 = vector.load %arg0[%c0_1, %c0_2] : memref<128x128xbf16, #tpu.memory_space<vmem>>, vector<128x128xbf16>
    %cst = arith.constant dense<0.000000e+00> : vector<128x128xf32>
    %2 = tpu.matmul %0, %1, %cst {dimension_numbers = #tpu.dot_dimension_numbers<[1], [0], [0], [1], [0, 0, 1, 1], [], []>} : vector<128x128xbf16>, vector<128x128xbf16>, vector<128x128xf32> -> vector<128x128xf32>
    %3 = arith.truncf %2 : vector<128x128xf32> to vector<128x128xbf16>
    %c0_3 = arith.constant 0 : index
    %c0_4 = arith.constant 0 : index
    %4 = vector.load %arg2[%c0_3, %c0_4] : memref<1040x384xbf16, #tpu.memory_space<vmem>>, vector<128x256xbf16>
    %cst_5 = arith.constant dense<0.000000e+00> : vector<128x256xf32>
    %5 = tpu.matmul %3, %4, %cst_5 {dimension_numbers = #tpu.dot_dimension_numbers<[1], [0], [0], [1], [0, 0, 1, 1], [], []>} : vector<128x128xbf16>, vector<128x256xbf16>, vector<128x256xf32> -> vector<128x256xf32>
    %cst_6 = arith.constant 0.000000e+00 : f32
    %6 = vector.broadcast %cst_6 : f32 to vector<128x256xf32>
    %7 = arith.maximumf %5, %6 : vector<128x256xf32>
    %c0_7 = arith.constant 0 : index
    %c0_8 = arith.constant 0 : index
    %8 = vector.load %arg1[%c0_7, %c0_8] : memref<128x128xbf16, #tpu.memory_space<vmem>>, vector<128x128xbf16>
    %9 = arith.truncf %7 : vector<128x256xf32> to vector<128x256xbf16>
    %cst_9 = arith.constant dense<0.000000e+00> : vector<128x256xf32>
    %10 = tpu.matmul %8, %9, %cst_9 {dimension_numbers = #tpu.dot_dimension_numbers<[1], [0], [0], [1], [0, 0, 1, 1], [], []>} : vector<128x128xbf16>, vector<128x256xbf16>, vector<128x256xf32> -> vector<128x256xf32>
    %11 = arith.truncf %10 : vector<128x256xf32> to vector<128x256xbf16>
    %c128 = arith.constant 128 : index
    %c0_10 = arith.constant 0 : index
    %12 = vector.load %arg2[%c128, %c0_10] : memref<1040x384xbf16, #tpu.memory_space<vmem>>, vector<256x384xbf16>
    %cst_11 = arith.constant dense<0.000000e+00> : vector<128x384xf32>
    %13 = tpu.matmul %11, %12, %cst_11 {dimension_numbers = #tpu.dot_dimension_numbers<[1], [0], [0], [1], [0, 0, 1, 1], [], []>} : vector<128x256xbf16>, vector<256x384xbf16>, vector<128x384xf32> -> vector<128x384xf32>
    %cst_12 = arith.constant 0.000000e+00 : f32
    %14 = vector.broadcast %cst_12 : f32 to vector<128x384xf32>
    %15 = arith.maximumf %13, %14 : vector<128x384xf32>
    %16 = arith.truncf %15 : vector<128x384xf32> to vector<128x384xbf16>
    %c384 = arith.constant 384 : index
    %c0_13 = arith.constant 0 : index
    %17 = vector.load %arg2[%c384, %c0_13] : memref<1040x384xbf16, #tpu.memory_space<vmem>>, vector<384x256xbf16>
    %cst_14 = arith.constant dense<0.000000e+00> : vector<128x256xf32>
    %18 = tpu.matmul %16, %17, %cst_14 {dimension_numbers = #tpu.dot_dimension_numbers<[1], [0], [0], [1], [0, 0, 1, 1], [], []>} : vector<128x384xbf16>, vector<384x256xbf16>, vector<128x256xf32> -> vector<128x256xf32>
    %c0_15 = arith.constant 0 : index
    %c0_16 = arith.constant 0 : index
    %19 = vector.load %arg1[%c0_15, %c0_16] : memref<128x128xbf16, #tpu.memory_space<vmem>>, vector<128x128xbf16>
    %20 = arith.truncf %18 : vector<128x256xf32> to vector<128x256xbf16>
    %cst_17 = arith.constant dense<0.000000e+00> : vector<128x256xf32>
    %21 = tpu.matmul %19, %20, %cst_17 {dimension_numbers = #tpu.dot_dimension_numbers<[1], [0], [0], [1], [0, 0, 1, 1], [], []>} : vector<128x128xbf16>, vector<128x256xbf16>, vector<128x256xf32> -> vector<128x256xf32>
    %cst_18 = arith.constant 0.000000e+00 : f32
    %22 = vector.broadcast %cst_18 : f32 to vector<128x256xf32>
    %23 = arith.maximumf %21, %22 : vector<128x256xf32>
    %c1024 = arith.constant 1024 : index
    %c0_19 = arith.constant 0 : index
    %24 = vector.load %arg2[%c1024, %c0_19] : memref<1040x384xbf16, #tpu.memory_space<vmem>>, vector<1x128xbf16>
    %25 = arith.extf %24 : vector<1x128xbf16> to vector<1x128xf32>
    %26 = arith.truncf %23 : vector<128x256xf32> to vector<128x256xbf16>
    %c768 = arith.constant 768 : index
    %c0_20 = arith.constant 0 : index
    %27 = vector.load %arg2[%c768, %c0_20] : memref<1040x384xbf16, #tpu.memory_space<vmem>>, vector<256x128xbf16>
    %cst_21 = arith.constant dense<0.000000e+00> : vector<128x128xf32>
    %28 = tpu.matmul %26, %27, %cst_21 {dimension_numbers = #tpu.dot_dimension_numbers<[1], [0], [0], [1], [0, 0, 1, 1], [], []>} : vector<128x256xbf16>, vector<256x128xbf16>, vector<128x128xf32> -> vector<128x128xf32>
    %29 = vector.broadcast %25 : vector<1x128xf32> to vector<128x128xf32>
    %30 = arith.addf %28, %29 : vector<128x128xf32>
    %cst_22 = arith.constant 0.000000e+00 : f32
    %31 = vector.broadcast %cst_22 : f32 to vector<128x128xf32>
    %32 = arith.maximumf %30, %31 : vector<128x128xf32>
    %33 = arith.truncf %32 : vector<128x128xf32> to vector<128x128xbf16>
    %c0_23 = arith.constant 0 : index
    %c0_24 = arith.constant 0 : index
    %34 = vector.load %arg3[%c0_23, %c0_24] : memref<128x128xbf16, #tpu.memory_space<vmem>>, vector<128x128xbf16>
    tpu.vector_store %arg3[%c0_23, %c0_24], %33 {strides = array<i32>} : memref<128x128xbf16, #tpu.memory_space<vmem>>, vector<128x128xbf16>,
    return
  }
}

</mosaic_0001>

<bundles_post_ra>
// kernel: forward.1
= control target key start
LH: loop header
LB: loop body
LE: loop exit
PB: predicated region body
PF: predicated region fallthrough
CT: control target
= control target key end

     0   :  { %8 = vsyncpa [#allocation3], 0  ;;  %s3111_s15 = smov [#allocation2]   ;;  %s3112_s17 = smov 192   ;;  %s3630_s0 = inlined_call_operand.vmem [shape: bf16[128,128], index: 0, kind: input, shape index: {}]   ;;  %s3631_s1 = inlined_call_operand.vmem [shape: bf16[128,128], index: 1, kind: input, shape index: {}]   ;;  %s3632_s2 = inlined_call_operand.hbm [shape: bf16[1040,384], index: 2, kind: input, shape index: {}]   ;;  %s3633_s3 = inlined_call_operand.vmem [shape: bf16[128,128], index: 3, kind: output, shape index: {}]  }
   0x1   :  { %s17_s14 = sshll.u32 %s3632_s2, 4  ;;  %s19_s16 = sshll.u32 %s3111_s15, 4  ;;  %s18_s14 = int_to_ptr.hbm [resolvable:$true] %s17_s14  ;;  %s20_s16 = int_to_ptr.vmem [resolvable:$true] %s19_s16 }
   0x2   :  { %s3113_s18 = smov 12  }
   0x3   :  { %25 = dma.hbm_to_vmem [thread:$0]  %s18_s14, 24960, %s20_s16, [#allocation3], %s3112_s17, %s3112_s17, %s3113_s18  }
   0x4   :  { %3109 = dma.done.wait [#allocation3], 24960  }
   0x5   :  { %3110 = vsyncadd [#allocation3], 4294942336  ;;  %v2874_v0 = vld [vmem:[%s3630_s0 + $0x38] sm:$0xff]  ;;  %v2873_v1 = vld [vmem:[%s3630_s0 + $0x30] sm:$0xff] }
   0x6   :  { %158 = vmatpush.bf16.msra.mxu0 %v2874_v0  ;;  %3050 = vmatpush.bf16.msra.mxu1 %v2874_v0  ;;  %v2872_v2 = vld [vmem:[%s3630_s0 + $0x28] sm:$0xff]  ;;  %v2871_v3 = vld [vmem:[%s3630_s0 + $0x20] sm:$0xff]  ;;  %v2870_v4 = vld [vmem:[%s3630_s0 + $0x18] sm:$0xff] }
   0x7   :  { %3051 = vmatpush.bf16.msra.mxu2 %v2874_v0  ;;  %3052 = vmatpush.bf16.msra.mxu3 %v2874_v0  ;;  %v2869_v5 = vld [vmem:[%s3630_s0 + $0x10] sm:$0xff]  ;;  %v2868_v6 = vld [vmem:[%s3630_s0 + $0x8] sm:$0xff]  ;;  %v2407_v10 = vld [vmem:[#allocation2 + $0xb4] sm:$0xf0] }
   0x8   :  { %v2405_v7 = vld [vmem:[#allocation2 + $0xa8] sm:$0xf]  ;;  %v2890_v8 = vld [vmem:[#allocation2 + $0xb0] sm:$0xf0]  ;;  %v2889_v9 = vld [vmem:[#allocation2 + $0xac] sm:$0xf] }
   0x9   :  { %v2867_v11 = vld [vmem:[%s3630_s0] sm:$0xff]  ;;  %v3169_v13 = vld [vmem:[%s3631_s1 + $0x10] sm:$0xff]  ;;  %v2406_v14 = vor.u32 %v2890_v8, %v2405_v7  ;;  %v2410_v15 = vor.u32 %v2889_v9, %v2407_v10  ;;  %v2888_v17 = vld [vmem:[#allocation2 + $0x98] sm:$0xf0] }
   0xa   :  { %159 = vmatpush.bf16.msra.mxu0 %v2873_v1  ;;  %3053 = vmatpush.bf16.msra.mxu1 %v2873_v1  ;;  %v3164_v12 = vld [vmem:[%s3631_s1] sm:$0xff]  ;;  %v2397_v16 = vld [vmem:[#allocation2 + $0x90] sm:$0xf]  ;;  %v2887_v18 = vld [vmem:[#allocation2 + $0x94] sm:$0xf] }
   0xb   :  { %3054 = vmatpush.bf16.msra.mxu2 %v2873_v1  ;;  %3055 = vmatpush.bf16.msra.mxu3 %v2873_v1  ;;  %v2399_v19 = vld [vmem:[#allocation2 + $0x9c] sm:$0xf0]  ;;  %v3179_v21 = vld [vmem:[%s3631_s1 + $0x30] sm:$0xff]  ;;  %v2398_v22 = vor.u32 %v2888_v17, %v2397_v16  ;;  %v2389_v24 = vld [vmem:[#allocation2 + $0x78] sm:$0xf] }
   0xc   :  { %v3174_v20 = vld [vmem:[%s3631_s1 + $0x20] sm:$0xff]  ;;  %v2402_v23 = vor.u32 %v2887_v18, %v2399_v19  ;;  %v2885_v26 = vld [vmem:[#allocation2 + $0x7c] sm:$0xf]  ;;  %v2391_v27 = vld [vmem:[#allocation2 + $0x84] sm:$0xf0] }
   0xd   :  { %v2886_v25 = vld [vmem:[#allocation2 + $0x80] sm:$0xf0]  ;;  %v2394_v29 = vor.u32 %v2885_v26, %v2391_v27  ;;  %v2381_v30 = vld [vmem:[#allocation2 + $0x60] sm:$0xf]  ;;  %v2884_v31 = vld [vmem:[#allocation2 + $0x68] sm:$0xf0] }
   0xe   :  { %160 = vmatpush.bf16.msra.mxu0 %v2872_v2  ;;  %3056 = vmatpush.bf16.msra.mxu1 %v2872_v2  ;;  %v2390_v28 = vor.u32 %v2886_v25, %v2389_v24  ;;  %v2883_v32 = vld [vmem:[#allocation2 + $0x64] sm:$0xf]  ;;  %v2383_v33 = vld [vmem:[#allocation2 + $0x6c] sm:$0xf0]  ;;  %v2382_v34 = vor.u32 %v2884_v31, %v2381_v30  ;;  %v2373_v36 = vld [vmem:[#allocation2 + $0x48] sm:$0xf] }
   0xf   :  { %3057 = vmatpush.bf16.msra.mxu2 %v2872_v2  ;;  %3058 = vmatpush.bf16.msra.mxu3 %v2872_v2  ;;  %v2386_v35 = vor.u32 %v2883_v32, %v2383_v33  ;;  %v2882_v37 = vld [vmem:[#allocation2 + $0x50] sm:$0xf0]  ;;  %v2881_v38 = vld [vmem:[#allocation2 + $0x4c] sm:$0xf]  ;;  %v2375_v39 = vld [vmem:[#allocation2 + $0x54] sm:$0xf0] }
  0x10   :  { %v2374_v40 = vor.u32 %v2882_v37, %v2373_v36  ;;  %v2378_v41 = vor.u32 %v2881_v38, %v2375_v39  ;;  %v3188_v42 = vld [vmem:[%s3631_s1 + $0x8] sm:$0xff]  ;;  %v3193_v43 = vld [vmem:[%s3631_s1 + $0x18] sm:$0xff]  ;;  %v2365_v46 = vld [vmem:[#allocation2 + $0x30] sm:$0xf] }
  0x11   :  { %v3198_v44 = vld [vmem:[%s3631_s1 + $0x28] sm:$0xff]  ;;  %v3203_v45 = vld [vmem:[%s3631_s1 + $0x38] sm:$0xff]  ;;  %v2879_v48 = vld [vmem:[#allocation2 + $0x34] sm:$0xf] }
  0x12   :  { %161 = vmatpush.bf16.msra.mxu0 %v2871_v3  ;;  %3059 = vmatpush.bf16.msra.mxu1 %v2871_v3  ;;  %v2880_v47 = vld [vmem:[#allocation2 + $0x38] sm:$0xf0]  ;;  %v2367_v50 = vld [vmem:[#allocation2 + $0x3c] sm:$0xf0]  ;;  %v2357_v52 = vld [vmem:[#allocation2 + $0x18] sm:$0xf] }
  0x13   :  { %3060 = vmatpush.bf16.msra.mxu2 %v2871_v3  ;;  %3061 = vmatpush.bf16.msra.mxu3 %v2871_v3  ;;  %v2366_v49 = vor.u32 %v2880_v47, %v2365_v46  ;;  %v2370_v51 = vor.u32 %v2879_v48, %v2367_v50  ;;  %v2878_v53 = vld [vmem:[#allocation2 + $0x20] sm:$0xf0]  ;;  %v2877_v54 = vld [vmem:[#allocation2 + $0x1c] sm:$0xf]  ;;  %v2359_v56 = vld [vmem:[#allocation2 + $0x24] sm:$0xf0] }
  0x14   :  { %v2358_v55 = vor.u32 %v2878_v53, %v2357_v52  ;;  %v2362_v57 = vor.u32 %v2877_v54, %v2359_v56  ;;  %v2349_v58 = vld [vmem:[#allocation2] sm:$0xf]  ;;  %v2876_v59 = vld [vmem:[#allocation2 + $0x8] sm:$0xf0]  ;;  %v2875_v60 = vld [vmem:[#allocation2 + $0x4] sm:$0xf] }
  0x15   :  { %v2350_v61 = vor.u32 %v2876_v59, %v2349_v58  ;;  %v2351_v62 = vld [vmem:[#allocation2 + $0xc] sm:$0xf0] }
  0x16   :  { %162 = vmatpush.bf16.msra.mxu0 %v2870_v4  ;;  %3062 = vmatpush.bf16.msra.mxu1 %v2870_v4  ;;  %v2354_v63 = vor.u32 %v2875_v60, %v2351_v62 }
  0x17   :  { %3063 = vmatpush.bf16.msra.mxu2 %v2870_v4  ;;  %3064 = vmatpush.bf16.msra.mxu3 %v2870_v4 }
  0x1a   :  { %163 = vmatpush.bf16.msra.mxu0 %v2869_v5  ;;  %3065 = vmatpush.bf16.msra.mxu1 %v2869_v5 }
  0x1b   :  { %3066 = vmatpush.bf16.msra.mxu2 %v2869_v5  ;;  %3067 = vmatpush.bf16.msra.mxu3 %v2869_v5 }
  0x1e   :  { %164 = vmatpush.bf16.msra.mxu0 %v2868_v6  ;;  %3068 = vmatpush.bf16.msra.mxu1 %v2868_v6 }
  0x1f   :  { %3069 = vmatpush.bf16.msra.mxu2 %v2868_v6  ;;  %3070 = vmatpush.bf16.msra.mxu3 %v2868_v6 }
  0x22   :  { %165 = vmatpush.bf16.msra.mxu0 %v2867_v11  ;;  %3071 = vmatpush.bf16.msra.mxu1 %v2867_v11 }
  0x23   :  { %3072 = vmatpush.bf16.msra.mxu2 %v2867_v11  ;;  %3073 = vmatpush.bf16.msra.mxu3 %v2867_v11 }
  0x25   :  { %166 = vmatmul.bf16.vlgmr.msra.gmra.mxu0 %v3164_v12  ;;  %176 = vmatmul.bf16.vlgmr.msra.gmra.mxu1 %v3169_v13 }
  0x26   :  { %311 = vmatpush.bf16.msrb.mxu1 %v2406_v14  ;;  %186 = vmatmul.bf16.vlgmr.msra.gmra.mxu2 %v3174_v20 }
  0x27   :  { %360 = vmatpush.bf16.msrb.mxu2 %v2410_v15  ;;  %196 = vmatmul.bf16.vlgmr.msra.gmra.mxu3 %v3179_v21 }
  0x2a   :  { %312 = vmatpush.bf16.msrb.mxu1 %v2398_v22 }
  0x2b   :  { %361 = vmatpush.bf16.msrb.mxu2 %v2402_v23 }
  0x2e   :  { %313 = vmatpush.bf16.msrb.mxu1 %v2390_v28 }
  0x2f   :  { %362 = vmatpush.bf16.msrb.mxu2 %v2394_v29 }
  0x32   :  { %314 = vmatpush.bf16.msrb.mxu1 %v2382_v34 }
  0x33   :  { %363 = vmatpush.bf16.msrb.mxu2 %v2386_v35 }
  0x35   :  { %171 = vmatmul.bf16.gmra.mxu0 %v3188_v42  ;;  %181 = vmatmul.bf16.gmra.mxu1 %v3193_v43 }
  0x36   :  { %315 = vmatpush.bf16.msrb.mxu1 %v2374_v40  ;;  %191 = vmatmul.bf16.gmra.mxu2 %v3198_v44 }
  0x37   :  { %364 = vmatpush.bf16.msrb.mxu2 %v2378_v41  ;;  %201 = vmatmul.bf16.gmra.mxu3 %v3203_v45 }
  0x3a   :  { %316 = vmatpush.bf16.msrb.mxu1 %v2366_v49 }
  0x3b   :  { %365 = vmatpush.bf16.msrb.mxu2 %v2370_v51 }
  0x3e   :  { %317 = vmatpush.bf16.msrb.mxu1 %v2358_v55 }
  0x3f   :  { %366 = vmatpush.bf16.msrb.mxu2 %v2362_v57 }
  0x42   :  { %318 = vmatpush.bf16.msrb.mxu1 %v2350_v61 }
  0x43   :  { %367 = vmatpush.bf16.msrb.mxu2 %v2354_v63 }
  0xa2   :  { %v167_v0 = vpop.f32.mrf.mxu0  ;;  %v177_v5 = vpop.f32.mrf.mxu1 }
  0xa9   :  { %v187_v11 = vpop.f32.mrf.mxu2 }
  0xaa   :  { %v169_v1 = vpop.f32.mrf.mxu0  ;;  %v179_v7 = vpop.f32.mrf.mxu1 }
  0xab   :  { %v207_v2 = vpack.c.bf16 %v169_v1, %v167_v0  ;;  %v209_v8 = vpack.c.bf16 %v179_v7, %v177_v5  ;;  %v197_v19 = vpop.f32.mrf.mxu3 }
  0xad   :  { %319 = vmatmul.bf16.vlgmr.msrb.gmra.mxu1 %v207_v2  ;;  %368 = vmatmul.bf16.vlgmr.msrb.gmra.mxu2 %v207_v2 }
  0xb1   :  { %v189_v15 = vpop.f32.mrf.mxu2 }
  0xb2   :  { %v172_v3 = vpop.f32.mrf.mxu0  ;;  %v182_v9 = vpop.f32.mrf.mxu1  ;;  %v211_v16 = vpack.c.bf16 %v189_v15, %v187_v11 }
  0xb3   :  { %v199_v23 = vpop.f32.mrf.mxu3 }
  0xb4   :  { %v213_v24 = vpack.c.bf16 %v199_v23, %v197_v19 }
  0xb9   :  { %v192_v17 = vpop.f32.mrf.mxu2 }
  0xba   :  { %v174_v4 = vpop.f32.mrf.mxu0  ;;  %v184_v10 = vpop.f32.mrf.mxu1 }
  0xbb   :  { %v208_v6 = vpack.c.bf16 %v174_v4, %v172_v3  ;;  %v210_v14 = vpack.c.bf16 %v184_v10, %v182_v9  ;;  %v202_v25 = vpop.f32.mrf.mxu3 }
  0xbd   :  { %324 = vmatmul.bf16.gmra.mxu1 %v208_v6  ;;  %373 = vmatmul.bf16.gmra.mxu2 %v208_v6 }
  0xc1   :  { %v194_v18 = vpop.f32.mrf.mxu2 }
  0xc2   :  { %v212_v22 = vpack.c.bf16 %v194_v18, %v192_v17 }
  0xc3   :  { %v204_v26 = vpop.f32.mrf.mxu3 }
  0xc4   :  { %v214_v27 = vpack.c.bf16 %v204_v26, %v202_v25 }
  0xcd   :  { %329 = vmatmul.bf16.gmra.mxu1 %v209_v8  ;;  %378 = vmatmul.bf16.gmra.mxu2 %v209_v8 }
  0xdd   :  { %334 = vmatmul.bf16.gmra.mxu1 %v210_v14  ;;  %383 = vmatmul.bf16.gmra.mxu2 %v210_v14 }
  0xed   :  { %339 = vmatmul.bf16.gmra.mxu1 %v211_v16  ;;  %388 = vmatmul.bf16.gmra.mxu2 %v211_v16 }
  0xfd   :  { %344 = vmatmul.bf16.gmra.mxu1 %v212_v22  ;;  %393 = vmatmul.bf16.gmra.mxu2 %v212_v22 }
 0x10d   :  { %349 = vmatmul.bf16.gmra.mxu1 %v213_v24  ;;  %398 = vmatmul.bf16.gmra.mxu2 %v213_v24 }
 0x11d   :  { %354 = vmatmul.bf16.gmra.mxu1 %v214_v27  ;;  %403 = vmatmul.bf16.gmra.mxu2 %v214_v27 }
 0x12a   :  { %v3209_v28 = vpop.f32.mrf.mxu1 }
 0x130   :  { %v3211_v29 = vpop.f32.mrf.mxu2 }
 0x132   :  { %v3213_v30 = vpop.f32.mrf.mxu1 }
 0x138   :  { %v3215_v31 = vpop.f32.mrf.mxu2 }
 0x13a   :  { %v3217_v32 = vpop.f32.mrf.mxu1 }
 0x140   :  { %v3219_v33 = vpop.f32.mrf.mxu2 }
 0x142   :  { %v3221_v34 = vpop.f32.mrf.mxu1 }
 0x148   :  { %v3223_v35 = vpop.f32.mrf.mxu2 }
 0x14a   :  { %v3225_v36 = vpop.f32.mrf.mxu1 }
 0x150   :  { %v3227_v37 = vpop.f32.mrf.mxu2 }
 0x152   :  { %v3229_v38 = vpop.f32.mrf.mxu1 }
 0x158   :  { %v3231_v39 = vpop.f32.mrf.mxu2 }
 0x15a   :  { %v335_v40 = vpop.f32.mrf.mxu1 }
 0x15b   :  { %v421_v25 = vmax.f32 %v335_v40, 0.0 }
 0x160   :  { %v3233_v41 = vpop.f32.mrf.mxu2 }
 0x162   :  { %v337_v46 = vpop.f32.mrf.mxu1 }
 0x163   :  { %v423_v22 = vmax.f32 %v337_v46, 0.0  ;;  %v415_v46 = vmax.f32 %v3221_v34, 0.0  ;;  %v416_v34 = vmax.f32 %v3223_v35, 0.0  ;;  %v2912_v35 = vld [vmem:[#allocation2 + $0x16c] sm:$0xf] }
 0x168   :  { %v3235_v47 = vpop.f32.mrf.mxu2 }
 0x16a   :  { %v340_v48 = vpop.f32.mrf.mxu1 }
 0x16b   :  { %v425_v17 = vmax.f32 %v340_v48, 0.0  ;;  %v424_v48 = vmax.f32 %v3235_v47, 0.0 }
 0x170   :  { %v389_v49 = vpop.f32.mrf.mxu2 }
 0x172   :  { %v342_v50 = vpop.f32.mrf.mxu1 }
 0x173   :  { %v427_v14 = vmax.f32 %v342_v50, 0.0  ;;  %v447_v50 = vpack.c.bf16 %v423_v22, %v421_v25  ;;  %v2571_v25 = vld [vmem:[#allocation2 + $0x204] sm:$0xf0] }
 0x175   :  { %v449_v24 = vpack.c.bf16 %v427_v14, %v425_v17  ;;  %v2907_v14 = vld [vmem:[#allocation2 + $0x140] sm:$0xf0] }
 0x176   :  { %v2931_v17 = vld [vmem:[#allocation2 + $0x200] sm:$0xf0] }
 0x178   :  { %v391_v51 = vpop.f32.mrf.mxu2 }
 0x179   :  { %v428_v26 = vmax.f32 %v391_v51, 0.0  ;;  %v413_v51 = vmax.f32 %v3217_v32, 0.0 }
 0x17a   :  { %v345_v52 = vpop.f32.mrf.mxu1 }
 0x17b   :  { %v429_v9 = vmax.f32 %v345_v52, 0.0  ;;  %v419_v52 = vmax.f32 %v3229_v38, 0.0  ;;  %v443_v47 = vpack.c.bf16 %v415_v46, %v413_v51  ;;  %v2463_v46 = vld [vmem:[#allocation2 + $0x12c] sm:$0xf0]  ;;  %v2449_v51 = vld [vmem:[#allocation2 + $0x108] sm:$0xf] }
 0x180   :  { %v394_v53 = vpop.f32.mrf.mxu2 }
 0x181   :  { %v430_v23 = vmax.f32 %v394_v53, 0.0  ;;  %v422_v53 = vmax.f32 %v3233_v41, 0.0 }
 0x182   :  { %v347_v54 = vpop.f32.mrf.mxu1 }
 0x183   :  { %v431_v5 = vmax.f32 %v347_v54, 0.0  ;;  %v426_v54 = vmax.f32 %v389_v49, 0.0  ;;  %v448_v38 = vpack.c.bf16 %v424_v48, %v422_v53  ;;  %v411_v49 = vmax.f32 %v3213_v30, 0.0  ;;  %v2927_v53 = vld [vmem:[#allocation2 + $0x1e4] sm:$0xf] }
 0x184   :  { %v410_v30 = vmax.f32 %v3211_v29, 0.0  ;;  %v2913_v29 = vld [vmem:[#allocation2 + $0x170] sm:$0xf0] }
 0x185   :  { %v451_v16 = vpack.c.bf16 %v431_v5, %v429_v9  ;;  %v2487_v5 = vld [vmem:[#allocation2 + $0x15c] sm:$0xf0] }
 0x186   :  { %v2583_v9 = vld [vmem:[#allocation2 + $0x21c] sm:$0xf0] }
 0x188   :  { %v396_v55 = vpop.f32.mrf.mxu2 }
 0x189   :  { %v432_v18 = vmax.f32 %v396_v55, 0.0  ;;  %v450_v55 = vpack.c.bf16 %v428_v26, %v426_v54  ;;  %v2461_v26 = vld [vmem:[#allocation2 + $0x120] sm:$0xf] }
 0x18a   :  { %v350_v56 = vpop.f32.mrf.mxu1  ;;  %v2557_v54 = vld [vmem:[#allocation2 + $0x1e0] sm:$0xf] }
 0x18b   :  { %v433_v3 = vmax.f32 %v350_v56, 0.0  ;;  %v452_v27 = vpack.c.bf16 %v432_v18, %v430_v23  ;;  %v417_v56 = vmax.f32 %v3225_v36, 0.0  ;;  %v418_v36 = vmax.f32 %v3227_v37, 0.0  ;;  %v2906_v18 = vld [vmem:[#allocation2 + $0x13c] sm:$0xf] }
 0x18d   :  { %v445_v40 = vpack.c.bf16 %v419_v52, %v417_v56  ;;  %v2904_v52 = vld [vmem:[#allocation2 + $0x128] sm:$0xf0] }
 0x18e   :  { %v2462_v56 = vor.u32 %v2904_v52, %v2461_v26 }
 0x190   :  { %v399_v57 = vpop.f32.mrf.mxu2 }
 0x191   :  { %v434_v15 = vmax.f32 %v399_v57, 0.0  ;;  %v420_v57 = vmax.f32 %v3231_v39, 0.0  ;;  %v412_v39 = vmax.f32 %v3215_v31, 0.0  ;;  %v2593_v31 = vld [vmem:[#allocation2 + $0x228] sm:$0xf] }
 0x192   :  { %v352_v58 = vpop.f32.mrf.mxu1 }
 0x193   :  { %v435_v1 = vmax.f32 %v352_v58, 0.0  ;;  %v409_v58 = vmax.f32 %v3209_v28, 0.0  ;;  %v446_v41 = vpack.c.bf16 %v420_v57, %v418_v36  ;;  %v442_v37 = vpack.c.bf16 %v412_v39, %v410_v30  ;;  %v2497_v28 = vld [vmem:[#allocation2 + $0x168] sm:$0xf]  ;;  %v2901_v57 = vld [vmem:[#allocation2 + $0x110] sm:$0xf0] }
 0x194   :  { %v2925_v36 = vld [vmem:[#allocation2 + $0x1d0] sm:$0xf0]  ;;  %v2437_v30 = vld [vmem:[#allocation2 + $0xf0] sm:$0xf] }
 0x195   :  { %v453_v8 = vpack.c.bf16 %v435_v1, %v433_v3  ;;  %v441_v32 = vpack.c.bf16 %v411_v49, %v409_v58  ;;  %v2581_v1 = vld [vmem:[#allocation2 + $0x210] sm:$0xf]  ;;  %v2934_v3 = vld [vmem:[#allocation2 + $0x218] sm:$0xf0]  ;;  %v2545_v49 = vld [vmem:[#allocation2 + $0x1c8] sm:$0xf]  ;;  %v2450_v58 = vor.u32 %v2901_v57, %v2449_v51 }
 0x198   :  { %v401_v59 = vpop.f32.mrf.mxu2 }
 0x199   :  { %v436_v10 = vmax.f32 %v401_v59, 0.0  ;;  %v414_v59 = vmax.f32 %v3219_v33, 0.0  ;;  %v2937_v33 = vld [vmem:[#allocation2 + $0x230] sm:$0xf0] }
 0x19a   :  { %v355_v60 = vpop.f32.mrf.mxu1 }
 0x19b   :  { %v437_v63 = vmax.f32 %v355_v60, 0.0  ;;  %v454_v19 = vpack.c.bf16 %v436_v10, %v434_v15  ;;  %v444_v60 = vpack.c.bf16 %v416_v34, %v414_v59  ;;  %v2569_v15 = vld [vmem:[#allocation2 + $0x1f8] sm:$0xf] }
 0x19c   :  { %v2570_v22 = vor.u32 %v2931_v17, %v2569_v15  ;;  %v2451_v34 = vld [vmem:[#allocation2 + $0x114] sm:$0xf0]  ;;  %v2916_v15 = vld [vmem:[#allocation2 + $0x188] sm:$0xf0]  ;;  %v2415_v17 = vld [vmem:[#allocation2 + $0xcc] sm:$0xf0] }
 0x19d   :  { %v2547_v59 = vld [vmem:[#allocation2 + $0x1d4] sm:$0xf0] }
 0x1a0   :  { %v404_v61 = vpop.f32.mrf.mxu2 }
 0x1a1   :  { %v438_v6 = vmax.f32 %v404_v61, 0.0  ;;  %v2499_v61 = vld [vmem:[#allocation2 + $0x174] sm:$0xf0] }
 0x1a2   :  { %v357_v62 = vpop.f32.mrf.mxu1 }
 0x1a3   :  { %v439_v0 = vmax.f32 %v357_v62, 0.0  ;;  %v2502_v62 = vor.u32 %v2912_v35, %v2499_v61 }
 0x1a5   :  { %v455_v2 = vpack.c.bf16 %v439_v0, %v437_v63  ;;  %v2936_v63 = vld [vmem:[#allocation2 + $0x22c] sm:$0xf]  ;;  %v2595_v0 = vld [vmem:[#allocation2 + $0x234] sm:$0xf0] }
 0x1a7   :  { %457 = vmatpush.bf16.msrb.mxu3 %v455_v2 }
 0x1a8   :  { %v406_v4 = vpop.f32.mrf.mxu2 }
 0x1a9   :  { %v440_v7 = vmax.f32 %v406_v4, 0.0  ;;  %v2909_v4 = vld [vmem:[#allocation2 + $0x154] sm:$0xf] }
 0x1ab   :  { %458 = vmatpush.bf16.msrb.mxu3 %v453_v8  ;;  %v456_v11 = vpack.c.bf16 %v440_v7, %v438_v6  ;;  %v2582_v6 = vor.u32 %v2934_v3, %v2581_v1  ;;  %v2490_v7 = vor.u32 %v2909_v4, %v2487_v5  ;;  %v2933_v8 = vld [vmem:[#allocation2 + $0x214] sm:$0xf]  ;;  %v2919_v1 = vld [vmem:[#allocation2 + $0x1a0] sm:$0xf0]  ;;  %v2427_v3 = vld [vmem:[#allocation2 + $0xe4] sm:$0xf0] }
 0x1ac   :  { %v2586_v10 = vor.u32 %v2933_v8, %v2583_v9  ;;  %v2413_v9 = vld [vmem:[#allocation2 + $0xc0] sm:$0xf] }
 0x1ad   :  { %506 = vmatpush.bf16.msrb.mxu0 %v456_v11  ;;  %v2473_v11 = vld [vmem:[#allocation2 + $0x138] sm:$0xf] }
 0x1af   :  { %459 = vmatpush.bf16.msrb.mxu3 %v451_v16  ;;  %v2474_v16 = vor.u32 %v2907_v14, %v2473_v11  ;;  %v2509_v11 = vld [vmem:[#allocation2 + $0x180] sm:$0xf] }
 0x1b1   :  { %507 = vmatpush.bf16.msrb.mxu0 %v454_v19  ;;  %v2475_v19 = vld [vmem:[#allocation2 + $0x144] sm:$0xf0] }
 0x1b2   :  { %v2478_v23 = vor.u32 %v2906_v18, %v2475_v19  ;;  %v2510_v18 = vor.u32 %v2916_v15, %v2509_v11  ;;  %v2929_v11 = vld [vmem:[#allocation2 + $0x1f0] sm:$0xf0] }
 0x1b3   :  { %460 = vmatpush.bf16.msrb.mxu3 %v449_v24  ;;  %v2930_v24 = vld [vmem:[#allocation2 + $0x1fc] sm:$0xf] }
 0x1b5   :  { %508 = vmatpush.bf16.msrb.mxu0 %v452_v27  ;;  %v2574_v27 = vor.u32 %v2930_v24, %v2571_v25 }
 0x1b7   :  { %461 = vmatpush.bf16.msrb.mxu3 %v447_v50  ;;  %v2928_v50 = vld [vmem:[#allocation2 + $0x1e8] sm:$0xf0] }
 0x1b8   :  { %v2558_v48 = vor.u32 %v2928_v50, %v2557_v54 }
 0x1b9   :  { %509 = vmatpush.bf16.msrb.mxu0 %v450_v55  ;;  %v2903_v55 = vld [vmem:[#allocation2 + $0x124] sm:$0xf] }
 0x1bb   :  { %462 = vmatpush.bf16.msrb.mxu3 %v445_v40  ;;  %v2466_v40 = vor.u32 %v2903_v55, %v2463_v46 }
 0x1bd   :  { %510 = vmatpush.bf16.msrb.mxu0 %v448_v38 }
 0x1bf   :  { %463 = vmatpush.bf16.msrb.mxu3 %v443_v47  ;;  %v2900_v47 = vld [vmem:[#allocation2 + $0x10c] sm:$0xf] }
 0x1c0   :  { %v2454_v39 = vor.u32 %v2900_v47, %v2451_v34 }
 0x1c1   :  { %511 = vmatpush.bf16.msrb.mxu0 %v446_v41  ;;  %v2924_v41 = vld [vmem:[#allocation2 + $0x1cc] sm:$0xf] }
 0x1c3   :  { %464 = vmatpush.bf16.msrb.mxu3 %v441_v32  ;;  %v2546_v32 = vor.u32 %v2925_v36, %v2545_v49 }
 0x1c5   :  { %512 = vmatpush.bf16.msrb.mxu0 %v444_v60  ;;  %v2550_v60 = vor.u32 %v2924_v41, %v2547_v59 }
 0x1c6   :  { %465 = vmatmul.bf16.vlgmr.msrb.gmra.mxu3 %v3164_v12 }
 0x1c7   :  { %989 = vmatpush.bf16.msra.mxu3 %v2502_v62  ;;  %v2535_v62 = vld [vmem:[#allocation2 + $0x1bc] sm:$0xf0] }
 0x1c9   :  { %513 = vmatpush.bf16.msrb.mxu0 %v442_v37  ;;  %v2898_v37 = vld [vmem:[#allocation2 + $0xf8] sm:$0xf0] }
 0x1cb   :  { %990 = vmatpush.bf16.msra.mxu3 %v2490_v7  ;;  %v2523_v7 = vld [vmem:[#allocation2 + $0x1a4] sm:$0xf0] }
 0x1cc   :  { %514 = vmatmul.bf16.vlgmr.msrb.gmra.mxu0 %v3164_v12  ;;  %v2498_v12 = vor.u32 %v2913_v29, %v2497_v28  ;;  %v2533_v28 = vld [vmem:[#allocation2 + $0x1b0] sm:$0xf]  ;;  %v2438_v29 = vor.u32 %v2898_v37, %v2437_v30 }
 0x1ce   :  { %891 = vmatpush.bf16.msra.mxu1 %v2498_v12  ;;  %v2897_v12 = vld [vmem:[#allocation2 + $0xf4] sm:$0xf] }
 0x1cf   :  { %991 = vmatpush.bf16.msra.mxu3 %v2478_v23  ;;  %v2511_v23 = vld [vmem:[#allocation2 + $0x18c] sm:$0xf0] }
 0x1d3   :  { %992 = vmatpush.bf16.msra.mxu3 %v2466_v40 }
 0x1d6   :  { %470 = vmatmul.bf16.gmra.mxu3 %v3188_v42 }
 0x1d7   :  { %993 = vmatpush.bf16.msra.mxu3 %v2454_v39 }
 0x1dc   :  { %519 = vmatmul.bf16.gmra.mxu0 %v3188_v42  ;;  %v2594_v42 = vor.u32 %v2937_v33, %v2593_v31  ;;  %v2922_v31 = vld [vmem:[#allocation2 + $0x1b8] sm:$0xf0]  ;;  %v2439_v33 = vld [vmem:[#allocation2 + $0xfc] sm:$0xf0] }
 0x1dd   :  { %v2534_v35 = vor.u32 %v2922_v31, %v2533_v28  ;;  %v2442_v61 = vor.u32 %v2897_v12, %v2439_v33  ;;  %v2505_v28 = vld [vmem:[#allocation2 + $0x170] sm:$0xf]  ;;  %v2938_v33 = vld [vmem:[#allocation2 + $0x238] sm:$0xf0] }
 0x1de   :  { %940 = vmatpush.bf16.msra.mxu2 %v2594_v42  ;;  %v2921_v42 = vld [vmem:[#allocation2 + $0x1b4] sm:$0xf]  ;;  %v2601_v31 = vld [vmem:[#allocation2 + $0x230] sm:$0xf] }
 0x1df   :  { %994 = vmatpush.bf16.msra.mxu3 %v2442_v61  ;;  %v2493_v61 = vld [vmem:[#allocation2 + $0x158] sm:$0xf] }
 0x1e2   :  { %941 = vmatpush.bf16.msra.mxu2 %v2582_v6  ;;  %v2918_v6 = vld [vmem:[#allocation2 + $0x19c] sm:$0xf] }
 0x1e3   :  { %v2526_v8 = vor.u32 %v2918_v6, %v2523_v7  ;;  %v2469_v7 = vld [vmem:[#allocation2 + $0x128] sm:$0xf] }
 0x1e6   :  { %475 = vmatmul.bf16.gmra.mxu3 %v3169_v13  ;;  %942 = vmatpush.bf16.msra.mxu2 %v2570_v22  ;;  %v2915_v22 = vld [vmem:[#allocation2 + $0x184] sm:$0xf] }
 0x1e7   :  { %v2514_v24 = vor.u32 %v2915_v22, %v2511_v23  ;;  %v2902_v22 = vld [vmem:[#allocation2 + $0x118] sm:$0xf0]  ;;  %v2553_v23 = vld [vmem:[#allocation2 + $0x1d0] sm:$0xf] }
 0x1ea   :  { %943 = vmatpush.bf16.msra.mxu2 %v2558_v48 }
 0x1ec   :  { %524 = vmatmul.bf16.gmra.mxu0 %v3169_v13  ;;  %v2598_v13 = vor.u32 %v2936_v63, %v2595_v0  ;;  %v2538_v63 = vor.u32 %v2921_v42, %v2535_v62  ;;  %v2425_v0 = vld [vmem:[#allocation2 + $0xd8] sm:$0xf]  ;;  %v2911_v42 = vld [vmem:[#allocation2 + $0x160] sm:$0xf0] }
 0x1ed   :  { %v2589_v62 = vld [vmem:[#allocation2 + $0x218] sm:$0xf] }
 0x1ee   :  { %1038 = vmatpush.bf16.msra.mxu0 %v2598_v13  ;;  %944 = vmatpush.bf16.msra.mxu2 %v2546_v32  ;;  %v2895_v13 = vld [vmem:[#allocation2 + $0xe0] sm:$0xf0] }
 0x1f2   :  { %1039 = vmatpush.bf16.msra.mxu0 %v2586_v10  ;;  %945 = vmatpush.bf16.msra.mxu2 %v2534_v35  ;;  %v2892_v10 = vld [vmem:[#allocation2 + $0xc8] sm:$0xf0]  ;;  %v2602_v35 = vor.u32 %v2938_v33, %v2601_v31  ;;  %v2433_v31 = vld [vmem:[#allocation2 + $0xe0] sm:$0xf] }
 0x1f3   :  { %v2414_v14 = vor.u32 %v2892_v10, %v2413_v9  ;;  %v2565_v9 = vld [vmem:[#allocation2 + $0x1e8] sm:$0xf]  ;;  %v2529_v33 = vld [vmem:[#allocation2 + $0x1a0] sm:$0xf] }
 0x1f6   :  { %480 = vmatmul.bf16.gmra.mxu3 %v3193_v43  ;;  %1040 = vmatpush.bf16.msra.mxu0 %v2574_v27 }
 0x1fc   :  { %529 = vmatmul.bf16.gmra.mxu0 %v3193_v43  ;;  %v2485_v43 = vld [vmem:[#allocation2 + $0x150] sm:$0xf] }
 0x206   :  { %485 = vmatmul.bf16.gmra.mxu3 %v3174_v20 }
 0x20c   :  { %534 = vmatmul.bf16.gmra.mxu0 %v3174_v20  ;;  %v2910_v20 = vld [vmem:[#allocation2 + $0x158] sm:$0xf0] }
 0x20d   :  { %v2486_v2 = vor.u32 %v2910_v20, %v2485_v43  ;;  %v2521_v43 = vld [vmem:[#allocation2 + $0x198] sm:$0xf]  ;;  %v2426_v20 = vor.u32 %v2895_v13, %v2425_v0  ;;  %v2935_v0 = vld [vmem:[#allocation2 + $0x220] sm:$0xf0] }
 0x20e   :  { %v2522_v4 = vor.u32 %v2919_v1, %v2521_v43  ;;  %v2481_v1 = vld [vmem:[#allocation2 + $0x140] sm:$0xf] }
 0x20f   :  { %892 = vmatpush.bf16.msra.mxu1 %v2486_v2  ;;  %v2894_v2 = vld [vmem:[#allocation2 + $0xdc] sm:$0xf] }
 0x210   :  { %v2430_v5 = vor.u32 %v2894_v2, %v2427_v3  ;;  %946 = vmatpush.bf16.msra.mxu2 %v2522_v4  ;;  %v2908_v2 = vld [vmem:[#allocation2 + $0x148] sm:$0xf0]  ;;  %v2577_v3 = vld [vmem:[#allocation2 + $0x200] sm:$0xf] }
 0x211   :  { %v2482_v4 = vor.u32 %v2908_v2, %v2481_v1  ;;  %v2421_v1 = vld [vmem:[#allocation2 + $0xc8] sm:$0xf]  ;;  %v2893_v2 = vld [vmem:[#allocation2 + $0xd0] sm:$0xf0] }
 0x212   :  { %995 = vmatpush.bf16.msra.mxu3 %v2430_v5  ;;  %v2932_v5 = vld [vmem:[#allocation2 + $0x208] sm:$0xf0] }
 0x213   :  { %893 = vmatpush.bf16.msra.mxu1 %v2474_v16  ;;  %v2891_v16 = vld [vmem:[#allocation2 + $0xc4] sm:$0xf]  ;;  %v2578_v6 = vor.u32 %v2932_v5, %v2577_v3  ;;  %v2517_v3 = vld [vmem:[#allocation2 + $0x188] sm:$0xf]  ;;  %v2917_v5 = vld [vmem:[#allocation2 + $0x190] sm:$0xf0] }
 0x214   :  { %v2418_v19 = vor.u32 %v2891_v16, %v2415_v17  ;;  %947 = vmatpush.bf16.msra.mxu2 %v2510_v18  ;;  %v2566_v16 = vor.u32 %v2929_v11, %v2565_v9  ;;  %v2637_v9 = vld [vmem:[#allocation2 + $0x2a0] sm:$0xf] }
 0x215   :  { %v2701_v11 = vld [vmem:[#allocation2 + $0x360] sm:$0xf] }
 0x216   :  { %490 = vmatmul.bf16.gmra.mxu3 %v3198_v44 }
 0x217   :  { %894 = vmatpush.bf16.msra.mxu1 %v2462_v56  ;;  %996 = vmatpush.bf16.msra.mxu3 %v2418_v19  ;;  %v2457_v19 = vld [vmem:[#allocation2 + $0x110] sm:$0xf] }
 0x218   :  { %1136 = vmatpush.bf16.msrb.mxu2 %v2602_v35 }
 0x21b   :  { %895 = vmatpush.bf16.msra.mxu1 %v2450_v58 }
 0x21c   :  { %539 = vmatmul.bf16.gmra.mxu0 %v3198_v44  ;;  %v2559_v44 = vld [vmem:[#allocation2 + $0x1ec] sm:$0xf0] }
 0x21d   :  { %v2562_v38 = vor.u32 %v2927_v53, %v2559_v44 }
 0x21f   :  { %1041 = vmatpush.bf16.msra.mxu0 %v2562_v38  ;;  %896 = vmatpush.bf16.msra.mxu1 %v2438_v29  ;;  %v2914_v29 = vld [vmem:[#allocation2 + $0x178] sm:$0xf0] }
 0x220   :  { %v2506_v12 = vor.u32 %v2914_v29, %v2505_v28 }
 0x223   :  { %1042 = vmatpush.bf16.msra.mxu0 %v2550_v60  ;;  %897 = vmatpush.bf16.msra.mxu1 %v2426_v20  ;;  %v2590_v20 = vor.u32 %v2935_v0, %v2589_v62  ;;  %v2950_v62 = vld [vmem:[#allocation2 + $0x2c0] sm:$0xf0]  ;;  %v2709_v0 = vld [vmem:[#allocation2 + $0x378] sm:$0xf] }
 0x225   :  { %1137 = vmatpush.bf16.msrb.mxu2 %v2590_v20 }
 0x226   :  { %495 = vmatmul.bf16.gmra.mxu3 %v3179_v21 }
 0x227   :  { %1043 = vmatpush.bf16.msra.mxu0 %v2538_v63  ;;  %898 = vmatpush.bf16.msra.mxu1 %v2414_v14  ;;  %v2494_v63 = vor.u32 %v2911_v42, %v2493_v61  ;;  %v2920_v61 = vld [vmem:[#allocation2 + $0x1a8] sm:$0xf0]  ;;  %v2645_v42 = vld [vmem:[#allocation2 + $0x2b8] sm:$0xf] }
 0x229   :  { %1138 = vmatpush.bf16.msrb.mxu2 %v2578_v6 }
 0x22b   :  { %1044 = vmatpush.bf16.msra.mxu0 %v2526_v8  ;;  %1087 = vmatpush.bf16.msrb.mxu1 %v2506_v12  ;;  %v2905_v8 = vld [vmem:[#allocation2 + $0x130] sm:$0xf0]  ;;  %v2896_v12 = vld [vmem:[#allocation2 + $0xe8] sm:$0xf0] }
 0x22c   :  { %544 = vmatmul.bf16.gmra.mxu0 %v3179_v21  ;;  %v2470_v10 = vor.u32 %v2905_v8, %v2469_v7  ;;  %v2434_v35 = vor.u32 %v2896_v12, %v2433_v31  ;;  %v2518_v8 = vor.u32 %v2917_v5, %v2517_v3  ;;  %v2669_v31 = vld [vmem:[#allocation2 + $0x300] sm:$0xf] }
 0x22d   :  { %1139 = vmatpush.bf16.msrb.mxu2 %v2566_v16 }
 0x22f   :  { %1045 = vmatpush.bf16.msra.mxu0 %v2514_v24  ;;  %1088 = vmatpush.bf16.msrb.mxu1 %v2494_v63  ;;  %v2458_v24 = vor.u32 %v2902_v22, %v2457_v19  ;;  %v2530_v63 = vor.u32 %v2920_v61, %v2529_v33  ;;  %v2964_v19 = vld [vmem:[#allocation2 + $0x368] sm:$0xf0] }
 0x230   :  { %v2702_v22 = vor.u32 %v2964_v19, %v2701_v11  ;;  %v2956_v61 = vld [vmem:[#allocation2 + $0x308] sm:$0xf0] }
 0x233   :  { %1089 = vmatpush.bf16.msrb.mxu1 %v2482_v4  ;;  %v2422_v4 = vor.u32 %v2893_v2, %v2421_v1 }
 0x236   :  { %500 = vmatmul.bf16.gmra.mxu3 %v3203_v45 }
 0x237   :  { %1090 = vmatpush.bf16.msrb.mxu1 %v2470_v10  ;;  %v2948_v10 = vld [vmem:[#allocation2 + $0x2a8] sm:$0xf0] }
 0x238   :  { %v2638_v16 = vor.u32 %v2948_v10, %v2637_v9 }
 0x23b   :  { %1091 = vmatpush.bf16.msrb.mxu1 %v2458_v24  ;;  %v2946_v24 = vld [vmem:[#allocation2 + $0x290] sm:$0xf0] }
 0x23c   :  { %549 = vmatmul.bf16.gmra.mxu0 %v3203_v45 }
 0x249   :  { %v466_v21 = vpop.f32.mrf.mxu3  ;;  %v515_v25 = vpop.f32.mrf.mxu0 }
 0x251   :  { %v468_v26 = vpop.f32.mrf.mxu3  ;;  %v517_v27 = vpop.f32.mrf.mxu0 }
 0x252   :  { %v3267_v52 = vpack.c.bf16 %v468_v26, %v466_v21  ;;  %v3269_v54 = vpack.c.bf16 %v517_v27, %v515_v25  ;;  %v2926_v21 = vld [vmem:[#allocation2 + $0x1d8] sm:$0xf0]  ;;  %v2661_v26 = vld [vmem:[#allocation2 + $0x2e8] sm:$0xf]  ;;  %v2954_v27 = vld [vmem:[#allocation2 + $0x2f0] sm:$0xf0] }
 0x253   :  { %v2554_v25 = vor.u32 %v2926_v21, %v2553_v23  ;;  %v2629_v23 = vld [vmem:[#allocation2 + $0x288] sm:$0xf] }
 0x254   :  { %899 = vmatmul.bf16.vlgmr.msra.gmra.mxu1 %v3267_v52  ;;  %948 = vmatmul.bf16.vlgmr.msra.gmra.mxu2 %v3269_v54  ;;  %v2693_v21 = vld [vmem:[#allocation2 + $0x348] sm:$0xf] }
 0x255   :  { %997 = vmatmul.bf16.vlgmr.msra.gmra.mxu3 %v3267_v52  ;;  %1046 = vmatmul.bf16.vlgmr.msra.gmra.mxu0 %v3269_v54 }
 0x256   :  { %1140 = vmatpush.bf16.msrb.mxu2 %v2554_v25  ;;  %v2630_v25 = vor.u32 %v2946_v24, %v2629_v23 }
 0x259   :  { %v471_v50 = vpop.f32.mrf.mxu3  ;;  %v520_v56 = vpop.f32.mrf.mxu0 }
 0x261   :  { %v473_v48 = vpop.f32.mrf.mxu3  ;;  %v522_v45 = vpop.f32.mrf.mxu0 }
 0x262   :  { %v3275_v55 = vpack.c.bf16 %v473_v48, %v471_v50  ;;  %v3277_v46 = vpack.c.bf16 %v522_v45, %v520_v56  ;;  %v2725_v50 = vld [vmem:[#allocation2 + $0x3a8] sm:$0xf]  ;;  %v2662_v56 = vor.u32 %v2954_v27, %v2661_v26  ;;  %v2970_v48 = vld [vmem:[#allocation2 + $0x3b0] sm:$0xf0]  ;;  %v2445_v45 = vld [vmem:[#allocation2 + $0xf8] sm:$0xf] }
 0x263   :  { %v2962_v26 = vld [vmem:[#allocation2 + $0x350] sm:$0xf0] }
 0x264   :  { %904 = vmatmul.bf16.gmra.mxu1 %v3275_v55  ;;  %953 = vmatmul.bf16.gmra.mxu2 %v3277_v46  ;;  %v2694_v27 = vor.u32 %v2962_v26, %v2693_v21 }
 0x265   :  { %1002 = vmatmul.bf16.gmra.mxu3 %v3275_v55  ;;  %1051 = vmatmul.bf16.gmra.mxu0 %v3277_v46 }
 0x266   :  { %1545 = vmatpush.bf16.msrb.mxu3 %v2662_v56 }
 0x269   :  { %v476_v53 = vpop.f32.mrf.mxu3  ;;  %v525_v40 = vpop.f32.mrf.mxu0 }
 0x271   :  { %v478_v44 = vpop.f32.mrf.mxu3  ;;  %v527_v51 = vpop.f32.mrf.mxu0 }
 0x272   :  { %v3283_v57 = vpack.c.bf16 %v478_v44, %v476_v53  ;;  %v3285_v38 = vpack.c.bf16 %v527_v51, %v525_v40  ;;  %v2899_v53 = vld [vmem:[#allocation2 + $0x100] sm:$0xf0]  ;;  %v2726_v40 = vor.u32 %v2970_v48, %v2725_v50  ;;  %v2541_v51 = vld [vmem:[#allocation2 + $0x1b8] sm:$0xf]  ;;  %v2621_v48 = vld [vmem:[#allocation2 + $0x270] sm:$0xf] }
 0x273   :  { %v2446_v44 = vor.u32 %v2899_v53, %v2445_v45  ;;  %v2944_v45 = vld [vmem:[#allocation2 + $0x278] sm:$0xf0]  ;;  %v2685_v53 = vld [vmem:[#allocation2 + $0x330] sm:$0xf] }
 0x274   :  { %909 = vmatmul.bf16.gmra.mxu1 %v3283_v57  ;;  %958 = vmatmul.bf16.gmra.mxu2 %v3285_v38 }
 0x275   :  { %1007 = vmatmul.bf16.gmra.mxu3 %v3283_v57  ;;  %1056 = vmatmul.bf16.gmra.mxu0 %v3285_v38 }
 0x276   :  { %1594 = vmatpush.bf16.msrb.mxu0 %v2726_v40  ;;  %1092 = vmatpush.bf16.msrb.mxu1 %v2446_v44  ;;  %v2622_v40 = vor.u32 %v2944_v45, %v2621_v48  ;;  %v2960_v44 = vld [vmem:[#allocation2 + $0x338] sm:$0xf0] }
 0x279   :  { %v481_v49 = vpop.f32.mrf.mxu3  ;;  %v530_v36 = vpop.f32.mrf.mxu0 }
 0x27a   :  { %1093 = vmatpush.bf16.msrb.mxu1 %v2434_v35 }
 0x27e   :  { %1094 = vmatpush.bf16.msrb.mxu1 %v2422_v4 }
 0x281   :  { %v483_v47 = vpop.f32.mrf.mxu3  ;;  %v532_v58 = vpop.f32.mrf.mxu0 }
 0x282   :  { %v3291_v34 = vpack.c.bf16 %v483_v47, %v481_v49  ;;  %v3293_v41 = vpack.c.bf16 %v532_v58, %v530_v36  ;;  %v2923_v49 = vld [vmem:[#allocation2 + $0x1c0] sm:$0xf0]  ;;  %v2653_v36 = vld [vmem:[#allocation2 + $0x2d0] sm:$0xf]  ;;  %v2952_v58 = vld [vmem:[#allocation2 + $0x2d8] sm:$0xf0] }
 0x283   :  { %v2542_v47 = vor.u32 %v2923_v49, %v2541_v51  ;;  %v2654_v28 = vor.u32 %v2952_v58, %v2653_v36  ;;  %v2686_v51 = vor.u32 %v2960_v44, %v2685_v53  ;;  %v2613_v49 = vld [vmem:[#allocation2 + $0x258] sm:$0xf]  ;;  %v2942_v36 = vld [vmem:[#allocation2 + $0x260] sm:$0xf0] }
 0x284   :  { %914 = vmatmul.bf16.gmra.mxu1 %v3291_v34  ;;  %963 = vmatmul.bf16.gmra.mxu2 %v3293_v41  ;;  %v2614_v58 = vor.u32 %v2942_v36, %v2613_v49 }
 0x285   :  { %1012 = vmatmul.bf16.gmra.mxu3 %v3291_v34  ;;  %1061 = vmatmul.bf16.gmra.mxu0 %v3293_v41 }
 0x286   :  { %1141 = vmatpush.bf16.msrb.mxu2 %v2542_v47  ;;  %1546 = vmatpush.bf16.msrb.mxu3 %v2654_v28  ;;  %v2677_v47 = vld [vmem:[#allocation2 + $0x318] sm:$0xf]  ;;  %v2605_v28 = vld [vmem:[#allocation2 + $0x240] sm:$0xf] }
 0x289   :  { %v486_v59 = vpop.f32.mrf.mxu3  ;;  %v535_v32 = vpop.f32.mrf.mxu0 }
 0x28a   :  { %1142 = vmatpush.bf16.msrb.mxu2 %v2530_v63 }
 0x28e   :  { %1143 = vmatpush.bf16.msrb.mxu2 %v2518_v8 }
 0x291   :  { %v488_v39 = vpop.f32.mrf.mxu3  ;;  %v537_v60 = vpop.f32.mrf.mxu0 }
 0x292   :  { %v3299_v30 = vpack.c.bf16 %v488_v39, %v486_v59  ;;  %v3301_v37 = vpack.c.bf16 %v537_v60, %v535_v32  ;;  %v2717_v59 = vld [vmem:[#allocation2 + $0x390] sm:$0xf]  ;;  %v2968_v32 = vld [vmem:[#allocation2 + $0x398] sm:$0xf0] }
 0x293   :  { %v2718_v29 = vor.u32 %v2968_v32, %v2717_v59  ;;  %v2958_v59 = vld [vmem:[#allocation2 + $0x320] sm:$0xf0] }
 0x294   :  { %919 = vmatmul.bf16.gmra.mxu1 %v3299_v30  ;;  %968 = vmatmul.bf16.gmra.mxu2 %v3301_v37  ;;  %v2678_v32 = vor.u32 %v2958_v59, %v2677_v47 }
 0x295   :  { %1017 = vmatmul.bf16.gmra.mxu3 %v3299_v30  ;;  %1066 = vmatmul.bf16.gmra.mxu0 %v3301_v37 }
 0x296   :  { %1595 = vmatpush.bf16.msrb.mxu0 %v2718_v29  ;;  %v2940_v29 = vld [vmem:[#allocation2 + $0x248] sm:$0xf0] }
 0x297   :  { %v2606_v35 = vor.u32 %v2940_v29, %v2605_v28 }
 0x299   :  { %v491_v13 = vpop.f32.mrf.mxu3  ;;  %v540_v43 = vpop.f32.mrf.mxu0 }
 0x2a1   :  { %v493_v14 = vpop.f32.mrf.mxu3  ;;  %v542_v15 = vpop.f32.mrf.mxu0 }
 0x2a2   :  { %v3307_v17 = vpack.c.bf16 %v493_v14, %v491_v13  ;;  %v3309_v18 = vpack.c.bf16 %v542_v15, %v540_v43  ;;  %v2966_v13 = vld [vmem:[#allocation2 + $0x380] sm:$0xf0]  ;;  %v2646_v43 = vor.u32 %v2950_v62, %v2645_v42  ;;  %v2670_v42 = vor.u32 %v2956_v61, %v2669_v31 }
 0x2a3   :  { %v2710_v20 = vor.u32 %v2966_v13, %v2709_v0 }
 0x2a4   :  { %924 = vmatmul.bf16.gmra.mxu1 %v3307_v17  ;;  %973 = vmatmul.bf16.gmra.mxu2 %v3309_v18 }
 0x2a5   :  { %1022 = vmatmul.bf16.gmra.mxu3 %v3307_v17  ;;  %1071 = vmatmul.bf16.gmra.mxu0 %v3309_v18 }
 0x2a6   :  { %1547 = vmatpush.bf16.msrb.mxu3 %v2646_v43  ;;  %1596 = vmatpush.bf16.msrb.mxu0 %v2710_v20 }
 0x2a9   :  { %v496_v39 = vpop.f32.mrf.mxu3  ;;  %v545_v60 = vpop.f32.mrf.mxu0 }
 0x2aa   :  { %1548 = vmatpush.bf16.msrb.mxu3 %v2638_v16  ;;  %1597 = vmatpush.bf16.msrb.mxu0 %v2702_v22 }
 0x2ae   :  { %1549 = vmatpush.bf16.msrb.mxu3 %v2630_v25  ;;  %1598 = vmatpush.bf16.msrb.mxu0 %v2694_v27 }
 0x2b1   :  { %v498_v6 = vpop.f32.mrf.mxu3  ;;  %v547_v7 = vpop.f32.mrf.mxu0 }
 0x2b2   :  { %v3315_v14 = vpack.c.bf16 %v498_v6, %v496_v39  ;;  %v3317_v15 = vpack.c.bf16 %v547_v7, %v545_v60  ;;  %1550 = vmatpush.bf16.msrb.mxu3 %v2622_v40  ;;  %1599 = vmatpush.bf16.msrb.mxu0 %v2686_v51 }
 0x2b4   :  { %929 = vmatmul.bf16.gmra.mxu1 %v3315_v14  ;;  %978 = vmatmul.bf16.gmra.mxu2 %v3317_v15 }
 0x2b5   :  { %1027 = vmatmul.bf16.gmra.mxu3 %v3315_v14  ;;  %1076 = vmatmul.bf16.gmra.mxu0 %v3317_v15 }
 0x2b6   :  { %1551 = vmatpush.bf16.msrb.mxu3 %v2614_v58  ;;  %1600 = vmatpush.bf16.msrb.mxu0 %v2678_v32 }
 0x2b9   :  { %v501_v50 = vpop.f32.mrf.mxu3  ;;  %v550_v56 = vpop.f32.mrf.mxu0 }
 0x2ba   :  { %1552 = vmatpush.bf16.msrb.mxu3 %v2606_v35  ;;  %1601 = vmatpush.bf16.msrb.mxu0 %v2670_v42 }
 0x2c1   :  { %v503_v39 = vpop.f32.mrf.mxu3  ;;  %v552_v60 = vpop.f32.mrf.mxu0 }
 0x2c2   :  { %v3323_v12 = vpack.c.bf16 %v503_v39, %v501_v50  ;;  %v3325_v33 = vpack.c.bf16 %v552_v60, %v550_v56 }
 0x2c4   :  { %934 = vmatmul.bf16.gmra.mxu1 %v3323_v12  ;;  %983 = vmatmul.bf16.gmra.mxu2 %v3325_v33 }
 0x2c5   :  { %1032 = vmatmul.bf16.gmra.mxu3 %v3323_v12  ;;  %1081 = vmatmul.bf16.gmra.mxu0 %v3325_v33 }
 0x2d1   :  { %v900_v62 = vpop.f32.mrf.mxu1 }
 0x2d2   :  { %v1047_v63 = vpop.f32.mrf.mxu0 }
 0x2d4   :  { %1095 = vmatmul.bf16.vlgmr.msrb.gmra.mxu1 %v3267_v52  ;;  %1144 = vmatmul.bf16.vlgmr.msrb.gmra.mxu2 %v3269_v54 }
 0x2d7   :  { %v949_v0 = vpop.f32.mrf.mxu2 }
 0x2d8   :  { %v998_v13 = vpop.f32.mrf.mxu3  ;;  %v950_v1 = vadd.f32 %v949_v0, %v900_v62 }
 0x2d9   :  { %v902_v43 = vpop.f32.mrf.mxu1  ;;  %v1048_v2 = vadd.f32 %v1047_v63, %v998_v13 }
 0x2da   :  { %v1049_v20 = vpop.f32.mrf.mxu0  ;;  %v1185_v8 = vmax.f32 %v950_v1, 0.0 }
 0x2db   :  { %v1186_v11 = vmax.f32 %v1048_v2, 0.0 }
 0x2df   :  { %v951_v3 = vpop.f32.mrf.mxu2 }
 0x2e0   :  { %v952_v4 = vadd.f32 %v951_v3, %v902_v43  ;;  %v1000_v5 = vpop.f32.mrf.mxu3 }
 0x2e1   :  { %v1050_v6 = vadd.f32 %v1049_v20, %v1000_v5  ;;  %v905_v7 = vpop.f32.mrf.mxu1 }
 0x2e2   :  { %v1188_v9 = vmax.f32 %v952_v4, 0.0  ;;  %v1052_v10 = vpop.f32.mrf.mxu0 }
 0x2e3   :  { %v1189_v16 = vmax.f32 %v1050_v6, 0.0 }
 0x2e4   :  { %v3333_v19 = vpack.c.bf16 %v1188_v9, %v1185_v8  ;;  %1100 = vmatmul.bf16.gmra.mxu1 %v3275_v55  ;;  %1149 = vmatmul.bf16.gmra.mxu2 %v3277_v46 }
 0x2e5   :  { %v3337_v52 = vpack.c.bf16 %v1189_v16, %v1186_v11  ;;  %v2953_v11 = vld [vmem:[#allocation2 + $0x2ec] sm:$0xf]  ;;  %v2663_v16 = vld [vmem:[#allocation2 + $0x2f4] sm:$0xf0] }
 0x2e6   :  { %1553 = vmatmul.bf16.vlgmr.msrb.gmra.mxu3 %v3333_v19 }
 0x2e7   :  { %1602 = vmatmul.bf16.vlgmr.msrb.gmra.mxu0 %v3337_v52  ;;  %v954_v54 = vpop.f32.mrf.mxu2 }
 0x2e8   :  { %v1003_v22 = vpop.f32.mrf.mxu3  ;;  %v955_v21 = vadd.f32 %v954_v54, %v905_v7 }
 0x2e9   :  { %v907_v23 = vpop.f32.mrf.mxu1  ;;  %v1053_v25 = vadd.f32 %v1052_v10, %v1003_v22  ;;  %v2666_v22 = vor.u32 %v2953_v11, %v2663_v16  ;;  %v2719_v16 = vld [vmem:[#allocation2 + $0x39c] sm:$0xf0] }
 0x2ea   :  { %v1054_v24 = vpop.f32.mrf.mxu0  ;;  %v1191_v55 = vmax.f32 %v955_v21, 0.0  ;;  %v2951_v21 = vld [vmem:[#allocation2 + $0x2d4] sm:$0xf] }
 0x2eb   :  { %v1192_v53 = vmax.f32 %v1053_v25, 0.0  ;;  %1692 = vmatpush.bf16.msra.mxu2 %v2666_v22  ;;  %v2655_v25 = vld [vmem:[#allocation2 + $0x2dc] sm:$0xf0]  ;;  %v2983_v22 = vld [vmem:[#allocation2 + $0x454] sm:$0xf] }
 0x2ef   :  { %v956_v26 = vpop.f32.mrf.mxu2 }
 0x2f0   :  { %v957_v27 = vadd.f32 %v956_v26, %v907_v23  ;;  %v1005_v50 = vpop.f32.mrf.mxu3 }
 0x2f1   :  { %v1055_v56 = vadd.f32 %v1054_v24, %v1005_v50  ;;  %v910_v48 = vpop.f32.mrf.mxu1 }
 0x2f2   :  { %v1194_v45 = vmax.f32 %v957_v27, 0.0  ;;  %v1057_v46 = vpop.f32.mrf.mxu0  ;;  %v2658_v27 = vor.u32 %v2951_v21, %v2655_v25  ;;  %v2783_v21 = vld [vmem:[#allocation2 + $0x45c] sm:$0xf0]  ;;  %v2941_v25 = vld [vmem:[#allocation2 + $0x25c] sm:$0xf] }
 0x2f3   :  { %v1195_v40 = vmax.f32 %v1055_v56, 0.0 }
 0x2f4   :  { %1105 = vmatmul.bf16.gmra.mxu1 %v3283_v57  ;;  %1154 = vmatmul.bf16.gmra.mxu2 %v3285_v38  ;;  %v3343_v44 = vpack.c.bf16 %v1194_v45, %v1191_v55 }
 0x2f5   :  { %v3345_v51 = vpack.c.bf16 %v1195_v40, %v1192_v53  ;;  %1693 = vmatpush.bf16.msra.mxu2 %v2658_v27  ;;  %v2947_v53 = vld [vmem:[#allocation2 + $0x2a4] sm:$0xf]  ;;  %v2639_v40 = vld [vmem:[#allocation2 + $0x2ac] sm:$0xf0]  ;;  %v2615_v27 = vld [vmem:[#allocation2 + $0x264] sm:$0xf0] }
 0x2f6   :  { %1558 = vmatmul.bf16.gmra.mxu3 %v3343_v44 }
 0x2f7   :  { %1607 = vmatmul.bf16.gmra.mxu0 %v3345_v51  ;;  %v959_v49 = vpop.f32.mrf.mxu2 }
 0x2f8   :  { %v1008_v36 = vpop.f32.mrf.mxu3  ;;  %v960_v59 = vadd.f32 %v959_v49, %v910_v48 }
 0x2f9   :  { %v912_v47 = vpop.f32.mrf.mxu1  ;;  %v1058_v32 = vadd.f32 %v1057_v46, %v1008_v36 }
 0x2fa   :  { %v1059_v58 = vpop.f32.mrf.mxu0  ;;  %v1197_v38 = vmax.f32 %v960_v59, 0.0 }
 0x2fb   :  { %v1198_v61 = vmax.f32 %v1058_v32, 0.0 }
 0x2ff   :  { %v961_v39 = vpop.f32.mrf.mxu2 }
 0x300   :  { %v962_v60 = vadd.f32 %v961_v39, %v912_v47  ;;  %v1010_v28 = vpop.f32.mrf.mxu3  ;;  %v2642_v47 = vor.u32 %v2947_v53, %v2639_v40  ;;  %v2775_v53 = vld [vmem:[#allocation2 + $0x444] sm:$0xf0] }
 0x301   :  { %v1060_v57 = vadd.f32 %v1059_v58, %v1010_v28  ;;  %v915_v29 = vpop.f32.mrf.mxu1 }
 0x302   :  { %v1200_v31 = vmax.f32 %v962_v60, 0.0  ;;  %v1062_v35 = vpop.f32.mrf.mxu0 }
 0x303   :  { %v1201_v42 = vmax.f32 %v1060_v57, 0.0 }
 0x304   :  { %1110 = vmatmul.bf16.gmra.mxu1 %v3291_v34  ;;  %1159 = vmatmul.bf16.gmra.mxu2 %v3293_v41  ;;  %v3351_v62 = vpack.c.bf16 %v1200_v31, %v1197_v38  ;;  %v2631_v38 = vld [vmem:[#allocation2 + $0x294] sm:$0xf0] }
 0x305   :  { %v3353_v63 = vpack.c.bf16 %v1201_v42, %v1198_v61  ;;  %v2789_v42 = vld [vmem:[#allocation2 + $0x468] sm:$0xf] }
 0x306   :  { %1563 = vmatmul.bf16.gmra.mxu3 %v3351_v62 }
 0x307   :  { %1612 = vmatmul.bf16.gmra.mxu0 %v3353_v63  ;;  %v964_v0 = vpop.f32.mrf.mxu2 }
 0x308   :  { %v1013_v13 = vpop.f32.mrf.mxu3  ;;  %v965_v1 = vadd.f32 %v964_v0, %v915_v29  ;;  %v2945_v29 = vld [vmem:[#allocation2 + $0x28c] sm:$0xf]  ;;  %v2986_v0 = vld [vmem:[#allocation2 + $0x470] sm:$0xf0] }
 0x309   :  { %v917_v43 = vpop.f32.mrf.mxu1  ;;  %v1063_v2 = vadd.f32 %v1062_v35, %v1013_v13  ;;  %v2634_v35 = vor.u32 %v2945_v29, %v2631_v38  ;;  %v2969_v13 = vld [vmem:[#allocation2 + $0x3ac] sm:$0xf] }
 0x30a   :  { %v1064_v20 = vpop.f32.mrf.mxu0  ;;  %v1203_v41 = vmax.f32 %v965_v1, 0.0  ;;  %v2985_v1 = vld [vmem:[#allocation2 + $0x46c] sm:$0xf] }
 0x30b   :  { %v1204_v9 = vmax.f32 %v1063_v2, 0.0  ;;  %v2791_v2 = vld [vmem:[#allocation2 + $0x474] sm:$0xf0] }
 0x30f   :  { %v966_v3 = vpop.f32.mrf.mxu2 }
 0x310   :  { %v967_v4 = vadd.f32 %v966_v3, %v917_v43  ;;  %v1015_v5 = vpop.f32.mrf.mxu3  ;;  %v2790_v43 = vor.u32 %v2986_v0, %v2789_v42  ;;  %v2963_v42 = vld [vmem:[#allocation2 + $0x364] sm:$0xf] }
 0x311   :  { %v1065_v34 = vadd.f32 %v1064_v20, %v1015_v5  ;;  %v920_v6 = vpop.f32.mrf.mxu1  ;;  %v2727_v20 = vld [vmem:[#allocation2 + $0x3b4] sm:$0xf0]  ;;  %v2623_v5 = vld [vmem:[#allocation2 + $0x27c] sm:$0xf0] }
 0x312   :  { %v1206_v7 = vmax.f32 %v967_v4, 0.0  ;;  %v1067_v8 = vpop.f32.mrf.mxu0  ;;  %v2730_v3 = vor.u32 %v2969_v13, %v2727_v20  ;;  %v2943_v4 = vld [vmem:[#allocation2 + $0x274] sm:$0xf]  ;;  %1643 = vmatpush.bf16.msra.mxu1 %v2790_v43  ;;  %v2703_v20 = vld [vmem:[#allocation2 + $0x36c] sm:$0xf0] }
 0x313   :  { %v1207_v10 = vmax.f32 %v1065_v34, 0.0 }
 0x314   :  { %1115 = vmatmul.bf16.gmra.mxu1 %v3299_v30  ;;  %1164 = vmatmul.bf16.gmra.mxu2 %v3301_v37  ;;  %v3359_v54 = vpack.c.bf16 %v1206_v7, %v1203_v41  ;;  %v2949_v30 = vld [vmem:[#allocation2 + $0x2bc] sm:$0xf]  ;;  %v2647_v37 = vld [vmem:[#allocation2 + $0x2c4] sm:$0xf0]  ;;  %v2781_v7 = vld [vmem:[#allocation2 + $0x450] sm:$0xf] }
 0x315   :  { %v3361_v23 = vpack.c.bf16 %v1207_v10, %v1204_v9  ;;  %v2650_v48 = vor.u32 %v2949_v30, %v2647_v37  ;;  %1741 = vmatpush.bf16.msra.mxu3 %v2730_v3  ;;  %v2967_v9 = vld [vmem:[#allocation2 + $0x394] sm:$0xf]  ;;  %v2982_v30 = vld [vmem:[#allocation2 + $0x440] sm:$0xf0]  ;;  %v2965_v37 = vld [vmem:[#allocation2 + $0x37c] sm:$0xf]  ;;  %v2706_v3 = vor.u32 %v2963_v42, %v2703_v20 }
 0x316   :  { %1568 = vmatmul.bf16.gmra.mxu3 %v3359_v54 }
 0x317   :  { %1617 = vmatmul.bf16.gmra.mxu0 %v3361_v23  ;;  %v969_v24 = vpop.f32.mrf.mxu2  ;;  %1694 = vmatpush.bf16.msra.mxu2 %v2650_v48 }
 0x318   :  { %v1018_v26 = vpop.f32.mrf.mxu3  ;;  %v970_v55 = vadd.f32 %v969_v24, %v920_v6  ;;  %v2626_v6 = vor.u32 %v2943_v4, %v2623_v5  ;;  %v2722_v24 = vor.u32 %v2967_v9, %v2719_v16  ;;  %v2695_v9 = vld [vmem:[#allocation2 + $0x354] sm:$0xf0] }
 0x319   :  { %v922_v50 = vpop.f32.mrf.mxu1  ;;  %v1068_v45 = vadd.f32 %v1067_v8, %v1018_v26  ;;  %v2984_v8 = vld [vmem:[#allocation2 + $0x458] sm:$0xf0]  ;;  %v2786_v26 = vor.u32 %v2983_v22, %v2783_v21  ;;  %v2749_v21 = vld [vmem:[#allocation2 + $0x3f0] sm:$0xf] }
 0x31a   :  { %v1069_v56 = vpop.f32.mrf.mxu0  ;;  %v1209_v32 = vmax.f32 %v970_v55, 0.0  ;;  %v2782_v11 = vor.u32 %v2984_v8, %v2781_v7  ;;  %1742 = vmatpush.bf16.msra.mxu3 %v2722_v24  ;;  %v2961_v7 = vld [vmem:[#allocation2 + $0x34c] sm:$0xf] }
 0x31b   :  { %1695 = vmatpush.bf16.msra.mxu2 %v2642_v47  ;;  %v1210_v28 = vmax.f32 %v1068_v45, 0.0  ;;  %v2711_v45 = vld [vmem:[#allocation2 + $0x384] sm:$0xf0] }
 0x31c   :  { %1644 = vmatpush.bf16.msra.mxu1 %v2782_v11  ;;  %v2759_v11 = vld [vmem:[#allocation2 + $0x414] sm:$0xf0] }
 0x31f   :  { %v971_v46 = vpop.f32.mrf.mxu2  ;;  %1696 = vmatpush.bf16.msra.mxu2 %v2634_v35  ;;  %v2980_v35 = vld [vmem:[#allocation2 + $0x428] sm:$0xf0] }
 0x320   :  { %v972_v49 = vadd.f32 %v971_v46, %v922_v50  ;;  %v1020_v36 = vpop.f32.mrf.mxu3  ;;  %v2618_v50 = vor.u32 %v2941_v25, %v2615_v27  ;;  %v2981_v46 = vld [vmem:[#allocation2 + $0x43c] sm:$0xf] }
 0x321   :  { %v1070_v58 = vadd.f32 %v1069_v56, %v1020_v36  ;;  %v925_v59 = vpop.f32.mrf.mxu1  ;;  %v2773_v56 = vld [vmem:[#allocation2 + $0x438] sm:$0xf]  ;;  %v2714_v36 = vor.u32 %v2965_v37, %v2711_v45  ;;  %v2778_v47 = vor.u32 %v2981_v46, %v2775_v53  ;;  %v2976_v25 = vld [vmem:[#allocation2 + $0x3f8] sm:$0xf0]  ;;  %v2751_v37 = vld [vmem:[#allocation2 + $0x3fc] sm:$0xf0] }
 0x322   :  { %v1212_v39 = vmax.f32 %v972_v49, 0.0  ;;  %v1072_v60 = vpop.f32.mrf.mxu0  ;;  %v2774_v55 = vor.u32 %v2982_v30, %v2773_v56  ;;  %v2750_v27 = vor.u32 %v2976_v25, %v2749_v21  ;;  %v2975_v56 = vld [vmem:[#allocation2 + $0x3f4] sm:$0xf]  ;;  %v2741_v45 = vld [vmem:[#allocation2 + $0x3d8] sm:$0xf] }
 0x323   :  { %v1213_v57 = vmax.f32 %v1070_v58, 0.0  ;;  %1697 = vmatpush.bf16.msra.mxu2 %v2626_v6  ;;  %v2939_v58 = vld [vmem:[#allocation2 + $0x244] sm:$0xf]  ;;  %1743 = vmatpush.bf16.msra.mxu3 %v2714_v36  ;;  %v2757_v6 = vld [vmem:[#allocation2 + $0x408] sm:$0xf] }
 0x324   :  { %1120 = vmatmul.bf16.gmra.mxu1 %v3307_v17  ;;  %1169 = vmatmul.bf16.gmra.mxu2 %v3309_v18  ;;  %v3367_v31 = vpack.c.bf16 %v1212_v39, %v1209_v32  ;;  %v2794_v18 = vor.u32 %v2985_v1, %v2791_v2  ;;  %v2607_v32 = vld [vmem:[#allocation2 + $0x24c] sm:$0xf0]  ;;  %v2979_v1 = vld [vmem:[#allocation2 + $0x424] sm:$0xf]  ;;  %v2957_v53 = vld [vmem:[#allocation2 + $0x31c] sm:$0xf] }
 0x325   :  { %v3369_v61 = vpack.c.bf16 %v1213_v57, %v1210_v28  ;;  %1645 = vmatpush.bf16.msra.mxu1 %v2774_v55  ;;  %v2610_v57 = vor.u32 %v2939_v58, %v2607_v32  ;;  %v2754_v55 = vor.u32 %v2975_v56, %v2751_v37  ;;  %v2974_v46 = vld [vmem:[#allocation2 + $0x3e0] sm:$0xf0]  ;;  %v2679_v36 = vld [vmem:[#allocation2 + $0x324] sm:$0xf0] }
 0x326   :  { %1573 = vmatmul.bf16.gmra.mxu3 %v3367_v31  ;;  %1790 = vmatpush.bf16.msra.mxu0 %v2794_v18  ;;  %v2767_v18 = vld [vmem:[#allocation2 + $0x42c] sm:$0xf0]  ;;  %v2743_v58 = vld [vmem:[#allocation2 + $0x3e4] sm:$0xf0] }
 0x327   :  { %1622 = vmatmul.bf16.gmra.mxu0 %v3369_v61  ;;  %v974_v17 = vpop.f32.mrf.mxu2  ;;  %1698 = vmatpush.bf16.msra.mxu2 %v2618_v50  ;;  %v2770_v5 = vor.u32 %v2979_v1, %v2767_v18  ;;  %v2687_v50 = vld [vmem:[#allocation2 + $0x33c] sm:$0xf0] }
 0x328   :  { %v1023_v34 = vpop.f32.mrf.mxu3  ;;  %v975_v48 = vadd.f32 %v974_v17, %v925_v59  ;;  %v2765_v59 = vld [vmem:[#allocation2 + $0x420] sm:$0xf]  ;;  %1744 = vmatpush.bf16.msra.mxu3 %v2706_v3 }
 0x329   :  { %v927_v41 = vpop.f32.mrf.mxu1  ;;  %v1073_v40 = vadd.f32 %v1072_v60, %v1023_v34  ;;  %v2766_v60 = vor.u32 %v2980_v35, %v2765_v59 }
 0x32a   :  { %v1074_v10 = vpop.f32.mrf.mxu0  ;;  %1791 = vmatpush.bf16.msra.mxu0 %v2786_v26  ;;  %v1215_v0 = vmax.f32 %v975_v48, 0.0  ;;  %v2959_v26 = vld [vmem:[#allocation2 + $0x334] sm:$0xf] }
 0x32b   :  { %v1216_v2 = vmax.f32 %v1073_v40, 0.0  ;;  %1699 = vmatpush.bf16.msra.mxu2 %v2610_v57  ;;  %1646 = vmatpush.bf16.msra.mxu1 %v2766_v60  ;;  %v2690_v30 = vor.u32 %v2959_v26, %v2687_v50  ;;  %v2955_v60 = vld [vmem:[#allocation2 + $0x304] sm:$0xf] }
 0x32e   :  { %1792 = vmatpush.bf16.msra.mxu0 %v2778_v47  ;;  %v2973_v47 = vld [vmem:[#allocation2 + $0x3dc] sm:$0xf] }
 0x32f   :  { %v976_v49 = vpop.f32.mrf.mxu2  ;;  %v2746_v57 = vor.u32 %v2973_v47, %v2743_v58 }
 0x330   :  { %v977_v39 = vadd.f32 %v976_v49, %v927_v41  ;;  %v1025_v28 = vpop.f32.mrf.mxu3  ;;  %v2978_v41 = vld [vmem:[#allocation2 + $0x410] sm:$0xf0]  ;;  %v2742_v49 = vor.u32 %v2974_v46, %v2741_v45 }
 0x331   :  { %v1075_v29 = vadd.f32 %v1074_v10, %v1025_v28  ;;  %v930_v38 = vpop.f32.mrf.mxu1  ;;  %v2758_v8 = vor.u32 %v2978_v41, %v2757_v6  ;;  %v2977_v10 = vld [vmem:[#allocation2 + $0x40c] sm:$0xf]  ;;  %v2682_v28 = vor.u32 %v2957_v53, %v2679_v36 }
 0x332   :  { %v1218_v13 = vmax.f32 %v977_v39, 0.0  ;;  %v1077_v43 = vpop.f32.mrf.mxu0  ;;  %1793 = vmatpush.bf16.msra.mxu0 %v2770_v5  ;;  %v2762_v16 = vor.u32 %v2977_v10, %v2759_v11  ;;  %v2735_v5 = vld [vmem:[#allocation2 + $0x3cc] sm:$0xf0] }
 0x333   :  { %v1219_v17 = vmax.f32 %v1075_v29, 0.0  ;;  %1647 = vmatpush.bf16.msra.mxu1 %v2758_v8 }
 0x334   :  { %1125 = vmatmul.bf16.gmra.mxu1 %v3315_v14  ;;  %1174 = vmatmul.bf16.gmra.mxu2 %v3317_v15  ;;  %v3375_v4 = vpack.c.bf16 %v1218_v13, %v1215_v0  ;;  %v2698_v15 = vor.u32 %v2961_v7, %v2695_v9  ;;  %v2733_v0 = vld [vmem:[#allocation2 + $0x3c0] sm:$0xf]  ;;  %v2972_v13 = vld [vmem:[#allocation2 + $0x3c8] sm:$0xf0] }
 0x335   :  { %v3377_v34 = vpack.c.bf16 %v1219_v17, %v1216_v2  ;;  %v2734_v1 = vor.u32 %v2972_v13, %v2733_v0  ;;  %v2671_v2 = vld [vmem:[#allocation2 + $0x30c] sm:$0xf0]  ;;  %v2971_v17 = vld [vmem:[#allocation2 + $0x3c4] sm:$0xf] }
 0x336   :  { %1578 = vmatmul.bf16.gmra.mxu3 %v3375_v4  ;;  %1794 = vmatpush.bf16.msra.mxu0 %v2762_v16  ;;  %v2674_v18 = vor.u32 %v2955_v60, %v2671_v2  ;;  %v2738_v41 = vor.u32 %v2971_v17, %v2735_v5 }
 0x337   :  { %1627 = vmatmul.bf16.gmra.mxu0 %v3377_v34  ;;  %v979_v14 = vpop.f32.mrf.mxu2  ;;  %1745 = vmatpush.bf16.msra.mxu3 %v2698_v15 }
 0x338   :  { %v1028_v22 = vpop.f32.mrf.mxu3  ;;  %1648 = vmatpush.bf16.msra.mxu1 %v2750_v27  ;;  %v980_v40 = vadd.f32 %v979_v14, %v930_v38 }
 0x339   :  { %v932_v24 = vpop.f32.mrf.mxu1  ;;  %v1078_v32 = vadd.f32 %v1077_v43, %v1028_v22 }
 0x33a   :  { %v1079_v48 = vpop.f32.mrf.mxu0  ;;  %1795 = vmatpush.bf16.msra.mxu0 %v2754_v55  ;;  %v1221_v20 = vmax.f32 %v980_v40, 0.0 }
 0x33b   :  { %1746 = vmatpush.bf16.msra.mxu3 %v2690_v30  ;;  %v1222_v3 = vmax.f32 %v1078_v32, 0.0 }
 0x33c   :  { %1649 = vmatpush.bf16.msra.mxu1 %v2742_v49 }
 0x33e   :  { %1796 = vmatpush.bf16.msra.mxu0 %v2746_v57 }
 0x33f   :  { %v981_v39 = vpop.f32.mrf.mxu2  ;;  %1747 = vmatpush.bf16.msra.mxu3 %v2682_v28 }
 0x340   :  { %v982_v29 = vadd.f32 %v981_v39, %v932_v24  ;;  %v1030_v59 = vpop.f32.mrf.mxu3  ;;  %1650 = vmatpush.bf16.msra.mxu1 %v2734_v1 }
 0x341   :  { %v1080_v35 = vadd.f32 %v1079_v48, %v1030_v59  ;;  %v935_v42 = vpop.f32.mrf.mxu1 }
 0x342   :  { %v1224_v38 = vmax.f32 %v982_v29, 0.0  ;;  %v1082_v8 = vpop.f32.mrf.mxu0  ;;  %1797 = vmatpush.bf16.msra.mxu0 %v2738_v41 }
 0x343   :  { %v1225_v43 = vmax.f32 %v1080_v35, 0.0  ;;  %1748 = vmatpush.bf16.msra.mxu3 %v2674_v18 }
 0x344   :  { %1130 = vmatmul.bf16.gmra.mxu1 %v3323_v12  ;;  %1179 = vmatmul.bf16.gmra.mxu2 %v3325_v33  ;;  %v3383_v6 = vpack.c.bf16 %v1224_v38, %v1221_v20 }
 0x345   :  { %v3385_v7 = vpack.c.bf16 %v1225_v43, %v1222_v3 }
 0x346   :  { %1583 = vmatmul.bf16.gmra.mxu3 %v3383_v6 }
 0x347   :  { %1632 = vmatmul.bf16.gmra.mxu0 %v3385_v7  ;;  %v984_v9 = vpop.f32.mrf.mxu2 }
 0x348   :  { %v1033_v10 = vpop.f32.mrf.mxu3  ;;  %v985_v14 = vadd.f32 %v984_v9, %v935_v42 }
 0x349   :  { %v937_v11 = vpop.f32.mrf.mxu1  ;;  %v1083_v12 = vadd.f32 %v1082_v8, %v1033_v10 }
 0x34a   :  { %v1084_v33 = vpop.f32.mrf.mxu0  ;;  %v1227_v25 = vmax.f32 %v985_v14, 0.0 }
 0x34b   :  { %v1228_v27 = vmax.f32 %v1083_v12, 0.0 }
 0x34f   :  { %v986_v15 = vpop.f32.mrf.mxu2 }
 0x350   :  { %v987_v16 = vadd.f32 %v986_v15, %v937_v11  ;;  %v1035_v22 = vpop.f32.mrf.mxu3 }
 0x351   :  { %v1085_v24 = vadd.f32 %v1084_v33, %v1035_v22  ;;  %v1096_v21 = vpop.f32.mrf.mxu1 }
 0x352   :  { %v1230_v26 = vmax.f32 %v987_v16, 0.0 }
 0x353   :  { %v1231_v50 = vmax.f32 %v1085_v24, 0.0 }
 0x354   :  { %1700 = vmatmul.bf16.vlgmr.msra.gmra.mxu2 %v3333_v19  ;;  %v3390_v56 = vpack.c.bf16 %v1230_v26, %v1227_v25 }
 0x355   :  { %v3392_v30 = vpack.c.bf16 %v1231_v50, %v1228_v27 }
 0x356   :  { %1588 = vmatmul.bf16.gmra.mxu3 %v3390_v56 }
 0x357   :  { %1637 = vmatmul.bf16.gmra.mxu0 %v3392_v30  ;;  %v1145_v37 = vpop.f32.mrf.mxu2 }
 0x358   :  { %v1146_v55 = vadd.f32 %v1145_v37, %v1096_v21 }
 0x359   :  { %v1098_v48 = vpop.f32.mrf.mxu1 }
 0x35a   :  { %v1187_v40 = vmax.f32 %v1146_v55, 0.0 }
 0x35f   :  { %v1147_v45 = vpop.f32.mrf.mxu2 }
 0x360   :  { %v1148_v46 = vadd.f32 %v1147_v45, %v1098_v48 }
 0x361   :  { %v1101_v53 = vpop.f32.mrf.mxu1 }
 0x362   :  { %v1190_v49 = vmax.f32 %v1148_v46, 0.0 }
 0x364   :  { %v1235_v36 = vpack.c.bf16 %v1190_v49, %v1187_v40  ;;  %v1603_v47 = vpop.f32.mrf.mxu0  ;;  %1705 = vmatmul.bf16.gmra.mxu2 %v3343_v44 }
 0x366   :  { %1651 = vmatmul.bf16.vlgmr.msra.gmra.mxu1 %v1235_v36  ;;  %1749 = vmatmul.bf16.vlgmr.msra.gmra.mxu3 %v3337_v52 }
 0x367   :  { %1798 = vmatmul.bf16.vlgmr.msra.gmra.mxu0 %v1235_v36  ;;  %v1150_v19 = vpop.f32.mrf.mxu2 }
 0x368   :  { %v1151_v57 = vadd.f32 %v1150_v19, %v1101_v53 }
 0x369   :  { %v1103_v58 = vpop.f32.mrf.mxu1  ;;  %v1554_v32 = vpop.f32.mrf.mxu3 }
 0x36a   :  { %v3398_v39 = vadd.f32 %v1603_v47, %v1554_v32  ;;  %v1193_v0 = vmax.f32 %v1151_v57, 0.0 }
 0x36c   :  { %v1605_v28 = vpop.f32.mrf.mxu0 }
 0x36f   :  { %v1152_v29 = vpop.f32.mrf.mxu2 }
 0x370   :  { %v1153_v59 = vadd.f32 %v1152_v29, %v1103_v58 }
 0x371   :  { %v1106_v35 = vpop.f32.mrf.mxu1  ;;  %v1556_v42 = vpop.f32.mrf.mxu3 }
 0x372   :  { %v1196_v13 = vmax.f32 %v1153_v59, 0.0  ;;  %v3400_v60 = vadd.f32 %v1605_v28, %v1556_v42 }
 0x374   :  { %v1608_v44 = vpop.f32.mrf.mxu0  ;;  %1710 = vmatmul.bf16.gmra.mxu2 %v3351_v62  ;;  %v1238_v52 = vpack.c.bf16 %v1196_v13, %v1193_v0 }
 0x376   :  { %1656 = vmatmul.bf16.gmra.mxu1 %v1238_v52  ;;  %1754 = vmatmul.bf16.gmra.mxu3 %v3345_v51 }
 0x377   :  { %1803 = vmatmul.bf16.gmra.mxu0 %v1238_v52  ;;  %v1155_v20 = vpop.f32.mrf.mxu2 }
 0x378   :  { %v1156_v3 = vadd.f32 %v1155_v20, %v1106_v35 }
 0x379   :  { %v1108_v38 = vpop.f32.mrf.mxu1  ;;  %v1559_v1 = vpop.f32.mrf.mxu3 }
 0x37a   :  { %v3404_v2 = vadd.f32 %v1608_v44, %v1559_v1  ;;  %v1199_v8 = vmax.f32 %v1156_v3, 0.0 }
 0x37c   :  { %v1610_v17 = vpop.f32.mrf.mxu0 }
 0x37f   :  { %v1157_v43 = vpop.f32.mrf.mxu2 }
 0x380   :  { %v1158_v18 = vadd.f32 %v1157_v43, %v1108_v38 }
 0x381   :  { %v1111_v5 = vpop.f32.mrf.mxu1  ;;  %v1561_v41 = vpop.f32.mrf.mxu3 }
 0x382   :  { %v1202_v9 = vmax.f32 %v1158_v18, 0.0  ;;  %v3406_v10 = vadd.f32 %v1610_v17, %v1561_v41 }
 0x384   :  { %v1613_v62 = vpop.f32.mrf.mxu0  ;;  %1715 = vmatmul.bf16.gmra.mxu2 %v3359_v54  ;;  %v1241_v51 = vpack.c.bf16 %v1202_v9, %v1199_v8 }
 0x386   :  { %1661 = vmatmul.bf16.gmra.mxu1 %v1241_v51  ;;  %1759 = vmatmul.bf16.gmra.mxu3 %v3353_v63 }
 0x387   :  { %1808 = vmatmul.bf16.gmra.mxu0 %v1241_v51  ;;  %v1160_v11 = vpop.f32.mrf.mxu2 }
 0x388   :  { %v1161_v16 = vadd.f32 %v1160_v11, %v1111_v5 }
 0x389   :  { %v1113_v14 = vpop.f32.mrf.mxu1  ;;  %v1564_v12 = vpop.f32.mrf.mxu3 }
 0x38a   :  { %v3410_v15 = vadd.f32 %v1613_v62, %v1564_v12  ;;  %v1205_v26 = vmax.f32 %v1161_v16, 0.0 }
 0x38c   :  { %v1615_v33 = vpop.f32.mrf.mxu0 }
 0x38f   :  { %v1162_v22 = vpop.f32.mrf.mxu2 }
 0x390   :  { %v1163_v24 = vadd.f32 %v1162_v22, %v1113_v14 }
 0x391   :  { %v1116_v21 = vpop.f32.mrf.mxu1  ;;  %v1566_v25 = vpop.f32.mrf.mxu3 }
 0x392   :  { %v1208_v27 = vmax.f32 %v1163_v24, 0.0  ;;  %v3412_v50 = vadd.f32 %v1615_v33, %v1566_v25 }
 0x394   :  { %v1618_v54 = vpop.f32.mrf.mxu0  ;;  %1720 = vmatmul.bf16.gmra.mxu2 %v3367_v31  ;;  %v1244_v63 = vpack.c.bf16 %v1208_v27, %v1205_v26 }
 0x396   :  { %1666 = vmatmul.bf16.gmra.mxu1 %v1244_v63  ;;  %1764 = vmatmul.bf16.gmra.mxu3 %v3361_v23 }
 0x397   :  { %1813 = vmatmul.bf16.gmra.mxu0 %v1244_v63  ;;  %v1165_v37 = vpop.f32.mrf.mxu2 }
 0x398   :  { %v1166_v53 = vadd.f32 %v1165_v37, %v1116_v21 }
 0x399   :  { %v1118_v48 = vpop.f32.mrf.mxu1  ;;  %v1569_v55 = vpop.f32.mrf.mxu3 }
 0x39a   :  { %v3416_v45 = vadd.f32 %v1618_v54, %v1569_v55  ;;  %v1211_v19 = vmax.f32 %v1166_v53, 0.0 }
 0x39c   :  { %v1620_v46 = vpop.f32.mrf.mxu0 }
 0x39f   :  { %v1167_v40 = vpop.f32.mrf.mxu2 }
 0x3a0   :  { %v1168_v49 = vadd.f32 %v1167_v40, %v1118_v48 }
 0x3a1   :  { %v1121_v36 = vpop.f32.mrf.mxu1  ;;  %v1571_v47 = vpop.f32.mrf.mxu3 }
 0x3a2   :  { %v1214_v58 = vmax.f32 %v1168_v49, 0.0  ;;  %v3418_v32 = vadd.f32 %v1620_v46, %v1571_v47 }
 0x3a4   :  { %v1623_v31 = vpop.f32.mrf.mxu0  ;;  %1725 = vmatmul.bf16.gmra.mxu2 %v3375_v4  ;;  %v1247_v23 = vpack.c.bf16 %v1214_v58, %v1211_v19 }
 0x3a6   :  { %1671 = vmatmul.bf16.gmra.mxu1 %v1247_v23  ;;  %1769 = vmatmul.bf16.gmra.mxu3 %v3369_v61 }
 0x3a7   :  { %1818 = vmatmul.bf16.gmra.mxu0 %v1247_v23  ;;  %v1170_v28 = vpop.f32.mrf.mxu2 }
 0x3a8   :  { %v1171_v42 = vadd.f32 %v1170_v28, %v1121_v36 }
 0x3a9   :  { %v1123_v57 = vpop.f32.mrf.mxu1  ;;  %v1574_v29 = vpop.f32.mrf.mxu3 }
 0x3aa   :  { %v3422_v59 = vadd.f32 %v1623_v31, %v1574_v29  ;;  %v1217_v20 = vmax.f32 %v1171_v42, 0.0 }
 0x3ac   :  { %v3424_v35 = vpop.f32.mrf.mxu0 }
 0x3af   :  { %v1172_v0 = vpop.f32.mrf.mxu2 }
 0x3b0   :  { %v1173_v13 = vadd.f32 %v1172_v0, %v1123_v57 }
 0x3b1   :  { %v1126_v44 = vpop.f32.mrf.mxu1  ;;  %v3426_v52 = vpop.f32.mrf.mxu3 }
 0x3b2   :  { %v1220_v4 = vmax.f32 %v1173_v13, 0.0 }
 0x3b4   :  { %v1628_v38 = vpop.f32.mrf.mxu0  ;;  %1730 = vmatmul.bf16.gmra.mxu2 %v3383_v6  ;;  %v1250_v61 = vpack.c.bf16 %v1220_v4, %v1217_v20 }
 0x3b6   :  { %1676 = vmatmul.bf16.gmra.mxu1 %v1250_v61  ;;  %1774 = vmatmul.bf16.gmra.mxu3 %v3377_v34 }
 0x3b7   :  { %1823 = vmatmul.bf16.gmra.mxu0 %v1250_v61  ;;  %v1175_v1 = vpop.f32.mrf.mxu2 }
 0x3b8   :  { %v1176_v5 = vadd.f32 %v1175_v1, %v1126_v44 }
 0x3b9   :  { %v1579_v17 = vpop.f32.mrf.mxu3  ;;  %v1128_v43 = vpop.f32.mrf.mxu1 }
 0x3ba   :  { %v3430_v3 = vadd.f32 %v1628_v38, %v1579_v17  ;;  %v1223_v62 = vmax.f32 %v1176_v5, 0.0 }
 0x3bc   :  { %v3432_v18 = vpop.f32.mrf.mxu0 }
 0x3bf   :  { %v1177_v41 = vpop.f32.mrf.mxu2 }
 0x3c0   :  { %v1178_v8 = vadd.f32 %v1177_v41, %v1128_v43 }
 0x3c1   :  { %v3434_v9 = vpop.f32.mrf.mxu3  ;;  %v1131_v34 = vpop.f32.mrf.mxu1 }
 0x3c2   :  { %v1226_v51 = vmax.f32 %v1178_v8, 0.0 }
 0x3c4   :  { %v1633_v6 = vpop.f32.mrf.mxu0  ;;  %1735 = vmatmul.bf16.gmra.mxu2 %v3390_v56  ;;  %v1253_v11 = vpack.c.bf16 %v1226_v51, %v1223_v62 }
 0x3c6   :  { %1681 = vmatmul.bf16.gmra.mxu1 %v1253_v11  ;;  %1779 = vmatmul.bf16.gmra.mxu3 %v3385_v7 }
 0x3c7   :  { %1828 = vmatmul.bf16.gmra.mxu0 %v1253_v11  ;;  %v1180_v14 = vpop.f32.mrf.mxu2 }
 0x3c8   :  { %v1181_v22 = vadd.f32 %v1180_v14, %v1131_v34 }
 0x3c9   :  { %v1584_v12 = vpop.f32.mrf.mxu3  ;;  %v1133_v24 = vpop.f32.mrf.mxu1 }
 0x3ca   :  { %v3438_v33 = vadd.f32 %v1633_v6, %v1584_v12  ;;  %v1229_v27 = vmax.f32 %v1181_v22, 0.0 }
 0x3cc   :  { %v3440_v16 = vpop.f32.mrf.mxu0 }
 0x3cf   :  { %v1182_v21 = vpop.f32.mrf.mxu2 }
 0x3d0   :  { %v1183_v25 = vadd.f32 %v1182_v21, %v1133_v24 }
 0x3d1   :  { %v3442_v26 = vpop.f32.mrf.mxu3 }
 0x3d2   :  { %v1232_v56 = vmax.f32 %v1183_v25, 0.0 }
 0x3d4   :  { %v1638_v54 = vpop.f32.mrf.mxu0  ;;  %v1256_v63 = vpack.c.bf16 %v1232_v56, %v1229_v27 }
 0x3d6   :  { %1686 = vmatmul.bf16.gmra.mxu1 %v1256_v63  ;;  %1784 = vmatmul.bf16.gmra.mxu3 %v3392_v30 }
 0x3d7   :  { %1833 = vmatmul.bf16.gmra.mxu0 %v1256_v63  ;;  %v1701_v7 = vpop.f32.mrf.mxu2 }
 0x3d9   :  { %v1589_v37 = vpop.f32.mrf.mxu3 }
 0x3da   :  { %v3445_v48 = vadd.f32 %v1638_v54, %v1589_v37 }
 0x3dc   :  { %v3447_v55 = vpop.f32.mrf.mxu0 }
 0x3df   :  { %v3449_v46 = vpop.f32.mrf.mxu2 }
 0x3e0   :  { %3638 = vst [vmem:[#allocation5_spill] sm:$0xff] %v3449_v46 }
 0x3e1   :  { %v3451_v53 = vpop.f32.mrf.mxu3 }
 0x3e2   :  { %v1641_v17 = vadd.f32 %v3447_v55, %v3451_v53 }
 0x3e3   :  { %v1652_v40 = vpop.f32.mrf.mxu1 }
 0x3e4   :  { %v3454_v49 = vadd.f32 %v1652_v40, %v3398_v39  ;;  %v1799_v36 = vpop.f32.mrf.mxu0  ;;  %v1636_v40 = vadd.f32 %v3440_v16, %v3442_v26  ;;  %v1626_v16 = vadd.f32 %v3424_v35, %v3426_v52 }
 0x3e6   :  { %3639 = vst [vmem:[#allocation6_spill] sm:$0xff] %v3454_v49 }
 0x3e7   :  { %v1706_v47 = vpop.f32.mrf.mxu2 }
 0x3e9   :  { %v1750_v19 = vpop.f32.mrf.mxu3 }
 0x3ea   :  { %v1751_v58 = vadd.f32 %v1750_v19, %v1701_v7 }
 0x3eb   :  { %v1654_v30 = vpop.f32.mrf.mxu1 }
 0x3ec   :  { %v3456_v31 = vadd.f32 %v1799_v36, %v1751_v58  ;;  %v3459_v23 = vadd.f32 %v1654_v30, %v3400_v60  ;;  %v3461_v28 = vpop.f32.mrf.mxu0 }
 0x3ed   :  { %3642 = vst [vmem:[#allocation9_spill] sm:$0xff] %v3461_v28 }
 0x3ee   :  { %3640 = vst [vmem:[#allocation7_spill] sm:$0xff] %v3456_v31 }
 0x3ef   :  { %3641 = vst [vmem:[#allocation8_spill] sm:$0xff] %v3459_v23  ;;  %v3465_v29 = vpop.f32.mrf.mxu2  ;;  %v1631_v23 = vadd.f32 %v3432_v18, %v3434_v9 }
 0x3f1   :  { %v3467_v42 = vpop.f32.mrf.mxu3 }
 0x3f2   :  { %3643 = vst [vmem:[#allocation10_spill] sm:$0xff] %v3467_v42 }
 0x3f3   :  { %v1657_v39 = vpop.f32.mrf.mxu1 }
 0x3f4   :  { %v3470_v0 = vadd.f32 %v1657_v39, %v3404_v2  ;;  %v1804_v13 = vpop.f32.mrf.mxu0 }
 0x3f6   :  { %3644 = vst [vmem:[#allocation11_spill] sm:$0xff] %v3470_v0 }
 0x3f7   :  { %v1711_v44 = vpop.f32.mrf.mxu2 }
 0x3f9   :  { %v1755_v20 = vpop.f32.mrf.mxu3 }
 0x3fa   :  { %v1756_v4 = vadd.f32 %v1755_v20, %v1706_v47 }
 0x3fb   :  { %v1659_v38 = vpop.f32.mrf.mxu1 }
 0x3fc   :  { %v3472_v60 = vadd.f32 %v1804_v13, %v1756_v4  ;;  %v3475_v61 = vadd.f32 %v1659_v38, %v3406_v10  ;;  %v3477_v1 = vpop.f32.mrf.mxu0 }
 0x3fd   :  { %3647 = vst [vmem:[#allocation14_spill] sm:$0xff] %v3477_v1 }
 0x3fe   :  { %3645 = vst [vmem:[#allocation12_spill] sm:$0xff] %v3472_v60 }
 0x3ff   :  { %3646 = vst [vmem:[#allocation13_spill] sm:$0xff] %v3475_v61  ;;  %v3481_v43 = vpop.f32.mrf.mxu2 }
 0x401   :  { %v3483_v5 = vpop.f32.mrf.mxu3 }
 0x403   :  { %v1662_v2 = vpop.f32.mrf.mxu1 }
 0x404   :  { %v3486_v41 = vadd.f32 %v1662_v2, %v3410_v15  ;;  %v1809_v8 = vpop.f32.mrf.mxu0 }
 0x407   :  { %v1716_v62 = vpop.f32.mrf.mxu2 }
 0x409   :  { %v1760_v51 = vpop.f32.mrf.mxu3 }
 0x40a   :  { %v1761_v6 = vadd.f32 %v1760_v51, %v1711_v44 }
 0x40b   :  { %v1664_v11 = vpop.f32.mrf.mxu1 }
 0x40c   :  { %v3488_v10 = vadd.f32 %v1809_v8, %v1761_v6  ;;  %v3491_v34 = vadd.f32 %v1664_v11, %v3412_v50  ;;  %v3493_v14 = vpop.f32.mrf.mxu0 }
 0x40e   :  { %3648 = vst [vmem:[#allocation15_spill] sm:$0xff] %v3488_v10 }
 0x40f   :  { %v3497_v22 = vpop.f32.mrf.mxu2 }
 0x411   :  { %v3499_v24 = vpop.f32.mrf.mxu3 }
 0x413   :  { %v1667_v15 = vpop.f32.mrf.mxu1 }
 0x414   :  { %v3502_v21 = vadd.f32 %v1667_v15, %v3416_v45  ;;  %v1814_v25 = vpop.f32.mrf.mxu0 }
 0x417   :  { %v1721_v54 = vpop.f32.mrf.mxu2 }
 0x419   :  { %v1765_v27 = vpop.f32.mrf.mxu3 }
 0x41a   :  { %v1766_v56 = vadd.f32 %v1765_v27, %v1716_v62 }
 0x41b   :  { %v1669_v63 = vpop.f32.mrf.mxu1 }
 0x41c   :  { %v3504_v50 = vadd.f32 %v1814_v25, %v1766_v56  ;;  %v3507_v7 = vadd.f32 %v1669_v63, %v3418_v32  ;;  %v3509_v37 = vpop.f32.mrf.mxu0 }
 0x41f   :  { %v1723_v58 = vpop.f32.mrf.mxu2 }
 0x421   :  { %v3513_v36 = vpop.f32.mrf.mxu3 }
 0x423   :  { %v1672_v47 = vpop.f32.mrf.mxu1 }
 0x424   :  { %v3516_v45 = vadd.f32 %v1672_v47, %v3422_v59  ;;  %v1819_v19 = vpop.f32.mrf.mxu0 }
 0x427   :  { %v1726_v20 = vpop.f32.mrf.mxu2 }
 0x429   :  { %v1770_v30 = vpop.f32.mrf.mxu3 }
 0x42a   :  { %v1771_v39 = vadd.f32 %v1770_v30, %v1721_v54 }
 0x42b   :  { %v1674_v13 = vpop.f32.mrf.mxu1 }
 0x42c   :  { %v3518_v44 = vadd.f32 %v1819_v19, %v1771_v39  ;;  %v3520_v32 = vpop.f32.mrf.mxu0  ;;  %v1675_v18 = vadd.f32 %v1674_v13, %v1626_v16  ;;  %v2994_v13 = vld [vmem:[#allocation2 + $0x530] sm:$0xf0] }
 0x42f   :  { %v1728_v8 = vpop.f32.mrf.mxu2 }
 0x431   :  { %v1772_v4 = vpop.f32.mrf.mxu3 }
 0x433   :  { %v1677_v38 = vpop.f32.mrf.mxu1 }
 0x434   :  { %v1824_v2 = vpop.f32.mrf.mxu0 }
 0x437   :  { %v1731_v59 = vpop.f32.mrf.mxu2 }
 0x439   :  { %v1775_v62 = vpop.f32.mrf.mxu3 }
 0x43b   :  { %v1679_v51 = vpop.f32.mrf.mxu1 }
 0x43c   :  { %v1826_v6 = vpop.f32.mrf.mxu0  ;;  %v1680_v0 = vadd.f32 %v1679_v51, %v1631_v23 }
 0x43f   :  { %v1733_v54 = vpop.f32.mrf.mxu2 }
 0x441   :  { %v1777_v11 = vpop.f32.mrf.mxu3 }
 0x443   :  { %v1682_v15 = vpop.f32.mrf.mxu1 }
 0x444   :  { %v1829_v25 = vpop.f32.mrf.mxu0  ;;  %v1683_v10 = vadd.f32 %v1682_v15, %v3438_v33  ;;  %v1778_v33 = vadd.f32 %v1777_v11, %v1728_v8  ;;  %v3663_v11 = vld [vmem:[#allocation7_spill] sm:$0xff] }
 0x445   :  { %v2857_v15 = vld [vmem:[#allocation2 + $0x5e8] sm:$0xf] }
 0x446   :  { %v1827_v35 = vadd.f32 %v1826_v6, %v1778_v33  ;;  %v3077_v6 = vld [vmem:[%s3631_s1] sm:$0xff]  ;;  %v3080_v33 = vld [vmem:[%s3631_s1 + $0x18] sm:$0xff] }
 0x447   :  { %v1736_v30 = vpop.f32.mrf.mxu2 }
 0x449   :  { %v1780_v27 = vpop.f32.mrf.mxu3 }
 0x44b   :  { %v1684_v56 = vpop.f32.mrf.mxu1 }
 0x44c   :  { %v1831_v63 = vpop.f32.mrf.mxu0  ;;  %v1685_v28 = vadd.f32 %v1684_v56, %v1636_v40 }
 0x44e   :  { %v1851_v55 = vpack.c.bf16 %v1685_v28, %v1683_v10  ;;  %v1773_v28 = vadd.f32 %v1772_v4, %v1723_v58  ;;  %v1763_v10 = vadd.f32 %v3499_v24, %v3481_v43  ;;  %v3650_v58 = vpack.c.bf16 %v3491_v34, %v3486_v41  ;;  %v3652_v43 = vld [vmem:[#allocation11_spill] sm:$0xff]  ;;  %v3656_v34 = vld [vmem:[#allocation14_spill] sm:$0xff] }
 0x44f   :  { %v1738_v42 = vpop.f32.mrf.mxu2 }
 0x451   :  { %v1782_v47 = vpop.f32.mrf.mxu3 }
 0x452   :  { %v1783_v53 = vadd.f32 %v1782_v47, %v1733_v54  ;;  %v2993_v54 = vld [vmem:[#allocation2 + $0x518] sm:$0xf0]  ;;  %v3078_v47 = vld [vmem:[%s3631_s1 + $0x8] sm:$0xff] }
 0x453   :  { %v1687_v19 = vpop.f32.mrf.mxu1 }
 0x454   :  { %v1834_v39 = vpop.f32.mrf.mxu0  ;;  %v1688_v31 = vadd.f32 %v1687_v19, %v3445_v48  ;;  %v1678_v48 = vadd.f32 %v1677_v38, %v3430_v3  ;;  %v1768_v3 = vadd.f32 %v3513_v36, %v3497_v22  ;;  %v1758_v22 = vadd.f32 %v3483_v5, %v3465_v29  ;;  %v3657_v38 = vld [vmem:[#allocation15_spill] sm:$0xff]  ;;  %v3658_v29 = vld [vmem:[#allocation8_spill] sm:$0xff]  ;;  %v3659_v5 = vld [vmem:[#allocation6_spill] sm:$0xff] }
 0x455   :  { %v1812_v36 = vadd.f32 %v3493_v14, %v1763_v10  ;;  %v3660_v14 = vpack.c.bf16 %v3658_v29, %v3659_v5  ;;  %v2853_v19 = vld [vmem:[#allocation2 + $0x5d0] sm:$0xf]  ;;  %v3082_v10 = vld [vmem:[%s3631_s1 + $0x28] sm:$0xff] }
 0x456   :  { %v1849_v9 = vpack.c.bf16 %v1680_v0, %v1678_v48  ;;  %v1822_v0 = vadd.f32 %v3520_v32, %v1773_v28  ;;  %v1817_v40 = vadd.f32 %v3509_v37, %v1768_v3  ;;  %v3651_v32 = vld [vmem:[#allocation13_spill] sm:$0xff]  ;;  %v1807_v4 = vadd.f32 %v3656_v34, %v1758_v22  ;;  %v2805_v3 = vld [vmem:[#allocation2 + $0x4b0] sm:$0xf]  ;;  %v2995_v34 = vld [vmem:[#allocation2 + $0x548] sm:$0xf0] }
 0x457   :  { %v3653_v24 = vpack.c.bf16 %v3651_v32, %v3652_v43  ;;  %v2849_v48 = vld [vmem:[#allocation2 + $0x5b8] sm:$0xf]  ;;  %v3083_v43 = vld [vmem:[%s3631_s1 + $0x30] sm:$0xff] }
 0x459   :  { %v1785_v57 = vpop.f32.mrf.mxu3 }
 0x45a   :  { %v1786_v1 = vadd.f32 %v1785_v57, %v1736_v30  ;;  %v3001_v30 = vld [vmem:[#allocation2 + $0x5d8] sm:$0xf0] }
 0x45b   :  { %v1689_v12 = vpop.f32.mrf.mxu1 }
 0x45c   :  { %v1690_v60 = vadd.f32 %v1689_v12, %v1641_v17  ;;  %v1836_v26 = vpop.f32.mrf.mxu0  ;;  %v1776_v12 = vadd.f32 %v1775_v62, %v1726_v20  ;;  %v3655_v20 = vld [vmem:[#allocation10_spill] sm:$0xff]  ;;  %v3662_v62 = vld [vmem:[#allocation12_spill] sm:$0xff] }
 0x45d   :  { %v1842_v51 = vpack.c.bf16 %v1807_v4, %v3662_v62 }
 0x45e   :  { %v1853_v49 = vpack.c.bf16 %v1690_v60, %v1688_v31  ;;  %v1781_v31 = vadd.f32 %v1780_v27, %v1731_v59  ;;  %v1835_v60 = vadd.f32 %v1834_v39, %v1786_v1  ;;  %v3649_v1 = vpack.c.bf16 %v3507_v7, %v3502_v21  ;;  %v2825_v7 = vld [vmem:[#allocation2 + $0x528] sm:$0xf]  ;;  %v2821_v27 = vld [vmem:[#allocation2 + $0x510] sm:$0xf]  ;;  %v2817_v39 = vld [vmem:[#allocation2 + $0x4f8] sm:$0xf] }
 0x45f   :  { %v1846_v21 = vpack.c.bf16 %v1817_v40, %v3504_v50  ;;  %v2826_v37 = vor.u32 %v2994_v13, %v2825_v7  ;;  %v3661_v50 = vld [vmem:[#allocation9_spill] sm:$0xff]  ;;  %v2837_v40 = vld [vmem:[#allocation2 + $0x570] sm:$0xf]  ;;  %v2996_v13 = vld [vmem:[#allocation2 + $0x560] sm:$0xf0] }
 0x460   :  { %1855 = vmatpush.bf16.msrb.mxu1 %v1853_v49  ;;  %v1832_v49 = vadd.f32 %v1831_v63, %v1783_v53  ;;  %v1830_v23 = vadd.f32 %v1829_v25, %v1781_v31  ;;  %v3002_v25 = vld [vmem:[#allocation2 + $0x5f0] sm:$0xf0]  ;;  %v2822_v63 = vor.u32 %v2993_v54, %v2821_v27  ;;  %v2992_v53 = vld [vmem:[#allocation2 + $0x500] sm:$0xf0]  ;;  %v2833_v7 = vld [vmem:[#allocation2 + $0x558] sm:$0xf] }
 0x461   :  { %v1787_v46 = vpop.f32.mrf.mxu3  ;;  %2132 = vmatpush.bf16.msrb.mxu3 %v2826_v37  ;;  %v2858_v56 = vor.u32 %v3002_v25, %v2857_v15  ;;  %v2818_v16 = vor.u32 %v2992_v53, %v2817_v39  ;;  %v3000_v31 = vld [vmem:[#allocation2 + $0x5c0] sm:$0xf0]  ;;  %v2834_v32 = vor.u32 %v2996_v13, %v2833_v7  ;;  %v2987_v37 = vld [vmem:[#allocation2 + $0x488] sm:$0xf0] }
 0x462   :  { %v1788_v61 = vadd.f32 %v1787_v46, %v1738_v42  ;;  %v1847_v46 = vpack.c.bf16 %v1675_v18, %v3516_v45  ;;  %v1852_v52 = vpack.c.bf16 %v1832_v49, %v1830_v23  ;;  %v1825_v42 = vadd.f32 %v1824_v2, %v1776_v12  ;;  %v2991_v18 = vld [vmem:[#allocation2 + $0x4e8] sm:$0xf0]  ;;  %v2845_v49 = vld [vmem:[#allocation2 + $0x5a0] sm:$0xf]  ;;  %v2809_v12 = vld [vmem:[#allocation2 + $0x4c8] sm:$0xf] }
 0x463   :  { %v1848_v45 = vpack.c.bf16 %v1822_v0, %v3518_v44  ;;  %v3654_v44 = vld [vmem:[#allocation5_spill] sm:$0xff]  ;;  %v1844_v2 = vpack.c.bf16 %v1812_v36, %v3657_v38  ;;  %2181 = vmatpush.bf16.msrb.mxu0 %v2858_v56  ;;  %v2988_v36 = vld [vmem:[#allocation2 + $0x4a0] sm:$0xf0] }
 0x464   :  { %v1837_v17 = vadd.f32 %v1836_v26, %v1788_v61  ;;  %1856 = vmatpush.bf16.msrb.mxu1 %v1851_v55  ;;  %v1850_v61 = vpack.c.bf16 %v1827_v35, %v1825_v42  ;;  %v1753_v41 = vadd.f32 %v3655_v20, %v3654_v44  ;;  %v2854_v55 = vor.u32 %v3001_v30, %v2853_v19  ;;  %v3079_v26 = vld [vmem:[%s3631_s1 + $0x10] sm:$0xff]  ;;  %v3081_v35 = vld [vmem:[%s3631_s1 + $0x20] sm:$0xff]  ;;  %v3084_v20 = vld [vmem:[%s3631_s1 + $0x38] sm:$0xff] }
 0x465   :  { %2133 = vmatpush.bf16.msrb.mxu3 %v2822_v63  ;;  %v2998_v42 = vld [vmem:[#allocation2 + $0x590] sm:$0xf0] }
 0x466   :  { %v1854_v57 = vpack.c.bf16 %v1837_v17, %v1835_v60  ;;  %v1802_v8 = vadd.f32 %v3661_v50, %v1753_v41  ;;  %v2813_v60 = vld [vmem:[#allocation2 + $0x4e0] sm:$0xf]  ;;  %v2850_v17 = vor.u32 %v3000_v31, %v2849_v48 }
 0x467   :  { %2182 = vmatpush.bf16.msrb.mxu0 %v2854_v55  ;;  %v2829_v41 = vld [vmem:[#allocation2 + $0x540] sm:$0xf] }
 0x468   :  { %1857 = vmatpush.bf16.msrb.mxu1 %v1849_v9  ;;  %1904 = vmatpush.bf16.msrb.mxu2 %v1854_v57  ;;  %v1840_v59 = vpack.c.bf16 %v1802_v8, %v3663_v11  ;;  %v2814_v9 = vor.u32 %v2991_v18, %v2813_v60  ;;  %v2999_v57 = vld [vmem:[#allocation2 + $0x5a8] sm:$0xf0]  ;;  %v2830_v4 = vor.u32 %v2995_v34, %v2829_v41 }
 0x469   :  { %2134 = vmatpush.bf16.msrb.mxu3 %v2818_v16  ;;  %v2846_v23 = vor.u32 %v2999_v57, %v2845_v49 }
 0x46b   :  { %2183 = vmatpush.bf16.msrb.mxu0 %v2850_v17 }
 0x46c   :  { %1858 = vmatpush.bf16.msrb.mxu1 %v1847_v46  ;;  %1905 = vmatpush.bf16.msrb.mxu2 %v1852_v52  ;;  %v2990_v46 = vld [vmem:[#allocation2 + $0x4d0] sm:$0xf0]  ;;  %v2841_v52 = vld [vmem:[#allocation2 + $0x588] sm:$0xf] }
 0x46d   :  { %2135 = vmatpush.bf16.msrb.mxu3 %v2814_v9  ;;  %v2810_v28 = vor.u32 %v2990_v46, %v2809_v12  ;;  %v2842_v0 = vor.u32 %v2998_v42, %v2841_v52 }
 0x46f   :  { %2184 = vmatpush.bf16.msrb.mxu0 %v2846_v23 }
 0x470   :  { %1859 = vmatpush.bf16.msrb.mxu1 %v3649_v1  ;;  %1906 = vmatpush.bf16.msrb.mxu2 %v1850_v61  ;;  %v2989_v61 = vld [vmem:[#allocation2 + $0x4b8] sm:$0xf0] }
 0x471   :  { %2136 = vmatpush.bf16.msrb.mxu3 %v2810_v28  ;;  %v2806_v1 = vor.u32 %v2989_v61, %v2805_v3 }
 0x473   :  { %2185 = vmatpush.bf16.msrb.mxu0 %v2842_v0 }
 0x474   :  { %1860 = vmatpush.bf16.msrb.mxu1 %v3650_v58  ;;  %1907 = vmatpush.bf16.msrb.mxu2 %v1848_v45  ;;  %v2997_v45 = vld [vmem:[#allocation2 + $0x578] sm:$0xf0]  ;;  %v2801_v58 = vld [vmem:[#allocation2 + $0x498] sm:$0xf] }
 0x475   :  { %2137 = vmatpush.bf16.msrb.mxu3 %v2806_v1  ;;  %v2838_v22 = vor.u32 %v2997_v45, %v2837_v40 }
 0x477   :  { %2186 = vmatpush.bf16.msrb.mxu0 %v2838_v22 }
 0x478   :  { %1861 = vmatpush.bf16.msrb.mxu1 %v3653_v24  ;;  %1908 = vmatpush.bf16.msrb.mxu2 %v1846_v21  ;;  %v2802_v21 = vor.u32 %v2988_v36, %v2801_v58  ;;  %v2797_v24 = vld [vmem:[#allocation2 + $0x480] sm:$0xf] }
 0x479   :  { %v2798_v44 = vor.u32 %v2987_v37, %v2797_v24 }
 0x47a   :  { %2138 = vmatpush.bf16.msrb.mxu3 %v2802_v21 }
 0x47b   :  { %2187 = vmatpush.bf16.msrb.mxu0 %v2834_v32 }
 0x47c   :  { %1862 = vmatpush.bf16.msrb.mxu1 %v3660_v14  ;;  %1909 = vmatpush.bf16.msrb.mxu2 %v1844_v2 }
 0x47e   :  { %2139 = vmatpush.bf16.msrb.mxu3 %v2798_v44 }
 0x47f   :  { %1863 = vmatmul.bf16.vlgmr.msrb.gmra.mxu1 %v3077_v6  ;;  %2188 = vmatpush.bf16.msrb.mxu0 %v2830_v4 }
 0x480   :  { %1910 = vmatpush.bf16.msrb.mxu2 %v1842_v51 }
 0x484   :  { %1911 = vmatpush.bf16.msrb.mxu2 %v1840_v59 }
 0x487   :  { %1912 = vmatmul.bf16.vlgmr.msrb.gmra.mxu2 %v3077_v6 }
 0x48f   :  { %1868 = vmatmul.bf16.gmra.mxu1 %v3078_v47 }
 0x497   :  { %1917 = vmatmul.bf16.gmra.mxu2 %v3078_v47 }
 0x49f   :  { %1873 = vmatmul.bf16.gmra.mxu1 %v3079_v26 }
 0x4a7   :  { %1922 = vmatmul.bf16.gmra.mxu2 %v3079_v26 }
 0x4af   :  { %1878 = vmatmul.bf16.gmra.mxu1 %v3080_v33 }
 0x4b7   :  { %1927 = vmatmul.bf16.gmra.mxu2 %v3080_v33 }
 0x4bf   :  { %1883 = vmatmul.bf16.gmra.mxu1 %v3081_v35 }
 0x4c7   :  { %1932 = vmatmul.bf16.gmra.mxu2 %v3081_v35 }
 0x4cf   :  { %1888 = vmatmul.bf16.gmra.mxu1 %v3082_v10 }
 0x4d7   :  { %1937 = vmatmul.bf16.gmra.mxu2 %v3082_v10 }
 0x4df   :  { %1893 = vmatmul.bf16.gmra.mxu1 %v3083_v43 }
 0x4e7   :  { %1942 = vmatmul.bf16.gmra.mxu2 %v3083_v43 }
 0x4ef   :  { %1898 = vmatmul.bf16.gmra.mxu1 %v3084_v20 }
 0x4f7   :  { %1947 = vmatmul.bf16.gmra.mxu2 %v3084_v20 }
 0x4fc   :  { %v1864_v38 = vpop.f32.mrf.mxu1 }
 0x4fd   :  { %v1953_v29 = vmax.f32 %v1864_v38, 0.0 }
 0x504   :  { %v1866_v2 = vpop.f32.mrf.mxu1 }
 0x505   :  { %v1955_v5 = vmax.f32 %v1866_v2, 0.0 }
 0x507   :  { %v1987_v14 = vpack.c.bf16 %v1955_v5, %v1953_v29 }
 0x509   :  { %2140 = vmatmul.bf16.vlgmr.msrb.gmra.mxu3 %v1987_v14 }
 0x50a   :  { %v1913_v50 = vpop.f32.mrf.mxu2 }
 0x50b   :  { %v1954_v51 = vmax.f32 %v1913_v50, 0.0 }
 0x50c   :  { %v1869_v8 = vpop.f32.mrf.mxu1 }
 0x50d   :  { %v1957_v59 = vmax.f32 %v1869_v8, 0.0 }
 0x512   :  { %v1915_v62 = vpop.f32.mrf.mxu2 }
 0x513   :  { %v1956_v6 = vmax.f32 %v1915_v62, 0.0 }
 0x514   :  { %v1871_v11 = vpop.f32.mrf.mxu1 }
 0x515   :  { %v1988_v15 = vpack.c.bf16 %v1956_v6, %v1954_v51  ;;  %v1959_v25 = vmax.f32 %v1871_v11, 0.0 }
 0x517   :  { %2189 = vmatmul.bf16.vlgmr.msrb.gmra.mxu0 %v1988_v15  ;;  %v1989_v27 = vpack.c.bf16 %v1959_v25, %v1957_v59 }
 0x519   :  { %2145 = vmatmul.bf16.gmra.mxu3 %v1989_v27 }
 0x51a   :  { %v1918_v56 = vpop.f32.mrf.mxu2 }
 0x51b   :  { %v1958_v47 = vmax.f32 %v1918_v56, 0.0 }
 0x51c   :  { %v1874_v54 = vpop.f32.mrf.mxu1 }
 0x51d   :  { %v1961_v39 = vmax.f32 %v1874_v54, 0.0 }
 0x522   :  { %v1920_v63 = vpop.f32.mrf.mxu2 }
 0x523   :  { %v1960_v19 = vmax.f32 %v1920_v63, 0.0  ;;  %v1985_v63 = vld [vmem:[#allocation2 + $0x600] sm:$0x1] }
 0x524   :  { %v1876_v30 = vpop.f32.mrf.mxu1 }
 0x525   :  { %v1990_v55 = vpack.c.bf16 %v1960_v19, %v1958_v47  ;;  %v1963_v53 = vmax.f32 %v1876_v30, 0.0  ;;  %v1986_v47 = vunpack.c.l.bf16 %v1985_v63 }
 0x527   :  { %2194 = vmatmul.bf16.gmra.mxu0 %v1990_v55  ;;  %v1991_v16 = vpack.c.bf16 %v1963_v53, %v1961_v39  ;;  %v3588_v39 = vperm.slane %v1986_v47, 0 }
 0x529   :  { %2150 = vmatmul.bf16.gmra.mxu3 %v1991_v16 }
 0x52a   :  { %v1923_v26 = vpop.f32.mrf.mxu2 }
 0x52b   :  { %v1962_v60 = vmax.f32 %v1923_v26, 0.0 }
 0x52c   :  { %v1879_v48 = vpop.f32.mrf.mxu1 }
 0x52d   :  { %v1965_v9 = vmax.f32 %v1879_v48, 0.0 }
 0x532   :  { %v1925_v31 = vpop.f32.mrf.mxu2 }
 0x533   :  { %v1964_v17 = vmax.f32 %v1925_v31, 0.0 }
 0x534   :  { %v1881_v18 = vpop.f32.mrf.mxu1 }
 0x535   :  { %v1992_v33 = vpack.c.bf16 %v1964_v17, %v1962_v60  ;;  %v1967_v49 = vmax.f32 %v1881_v18, 0.0 }
 0x537   :  { %2199 = vmatmul.bf16.gmra.mxu0 %v1992_v33  ;;  %v1993_v57 = vpack.c.bf16 %v1967_v49, %v1965_v9 }
 0x539   :  { %2155 = vmatmul.bf16.gmra.mxu3 %v1993_v57 }
 0x53a   :  { %v1928_v12 = vpop.f32.mrf.mxu2 }
 0x53b   :  { %v1966_v28 = vmax.f32 %v1928_v12, 0.0 }
 0x53c   :  { %v1884_v23 = vpop.f32.mrf.mxu1 }
 0x53d   :  { %v1969_v42 = vmax.f32 %v1884_v23, 0.0 }
 0x542   :  { %v1930_v46 = vpop.f32.mrf.mxu2 }
 0x543   :  { %v1968_v35 = vmax.f32 %v1930_v46, 0.0 }
 0x544   :  { %v1886_v52 = vpop.f32.mrf.mxu1 }
 0x545   :  { %v1994_v3 = vpack.c.bf16 %v1968_v35, %v1966_v28  ;;  %v1971_v0 = vmax.f32 %v1886_v52, 0.0 }
 0x547   :  { %2204 = vmatmul.bf16.gmra.mxu0 %v1994_v3  ;;  %v1995_v61 = vpack.c.bf16 %v1971_v0, %v1969_v42 }
 0x549   :  { %2160 = vmatmul.bf16.gmra.mxu3 %v1995_v61 }
 0x54a   :  { %v1933_v1 = vpop.f32.mrf.mxu2 }
 0x54b   :  { %v1970_v45 = vmax.f32 %v1933_v1, 0.0 }
 0x54c   :  { %v1889_v10 = vpop.f32.mrf.mxu1 }
 0x54d   :  { %v1973_v36 = vmax.f32 %v1889_v10, 0.0 }
 0x552   :  { %v1935_v40 = vpop.f32.mrf.mxu2 }
 0x553   :  { %v1972_v58 = vmax.f32 %v1935_v40, 0.0 }
 0x554   :  { %v1891_v22 = vpop.f32.mrf.mxu1 }
 0x555   :  { %v1996_v21 = vpack.c.bf16 %v1972_v58, %v1970_v45  ;;  %v1975_v7 = vmax.f32 %v1891_v22, 0.0 }
 0x557   :  { %2209 = vmatmul.bf16.gmra.mxu0 %v1996_v21  ;;  %v1997_v13 = vpack.c.bf16 %v1975_v7, %v1973_v36 }
 0x559   :  { %2165 = vmatmul.bf16.gmra.mxu3 %v1997_v13 }
 0x55a   :  { %v1938_v32 = vpop.f32.mrf.mxu2 }
 0x55b   :  { %v1974_v37 = vmax.f32 %v1938_v32, 0.0 }
 0x55c   :  { %v1894_v43 = vpop.f32.mrf.mxu1 }
 0x55d   :  { %v1977_v41 = vmax.f32 %v1894_v43, 0.0 }
 0x562   :  { %v1940_v24 = vpop.f32.mrf.mxu2 }
 0x563   :  { %v1976_v44 = vmax.f32 %v1940_v24, 0.0 }
 0x564   :  { %v1896_v20 = vpop.f32.mrf.mxu1 }
 0x565   :  { %v1998_v34 = vpack.c.bf16 %v1976_v44, %v1974_v37  ;;  %v1979_v4 = vmax.f32 %v1896_v20, 0.0 }
 0x567   :  { %2214 = vmatmul.bf16.gmra.mxu0 %v1998_v34  ;;  %v1999_v38 = vpack.c.bf16 %v1979_v4, %v1977_v41 }
 0x569   :  { %2170 = vmatmul.bf16.gmra.mxu3 %v1999_v38 }
 0x56a   :  { %v1943_v2 = vpop.f32.mrf.mxu2 }
 0x56b   :  { %v1978_v14 = vmax.f32 %v1943_v2, 0.0 }
 0x56c   :  { %v1899_v29 = vpop.f32.mrf.mxu1 }
 0x56d   :  { %v1981_v62 = vmax.f32 %v1899_v29, 0.0 }
 0x572   :  { %v1945_v5 = vpop.f32.mrf.mxu2 }
 0x573   :  { %v1980_v50 = vmax.f32 %v1945_v5, 0.0 }
 0x574   :  { %v1901_v8 = vpop.f32.mrf.mxu1 }
 0x575   :  { %v2000_v51 = vpack.c.bf16 %v1980_v50, %v1978_v14  ;;  %v1983_v6 = vmax.f32 %v1901_v8, 0.0 }
 0x577   :  { %2219 = vmatmul.bf16.gmra.mxu0 %v2000_v51  ;;  %v2001_v11 = vpack.c.bf16 %v1983_v6, %v1981_v62 }
 0x579   :  { %2175 = vmatmul.bf16.gmra.mxu3 %v2001_v11 }
 0x57a   :  { %v1948_v59 = vpop.f32.mrf.mxu2 }
 0x57b   :  { %v1982_v25 = vmax.f32 %v1948_v59, 0.0 }
 0x582   :  { %v1950_v15 = vpop.f32.mrf.mxu2 }
 0x583   :  { %v1984_v27 = vmax.f32 %v1950_v15, 0.0 }
 0x585   :  { %v2002_v56 = vpack.c.bf16 %v1984_v27, %v1982_v25 }
 0x587   :  { %2224 = vmatmul.bf16.gmra.mxu0 %v2002_v56 }
 0x58c   :  { %v2141_v54 = vpop.f32.mrf.mxu3 }
 0x58d   :  { %v2142_v55 = vadd.f32 %v2141_v54, %v3588_v39 }
 0x594   :  { %v2190_v19 = vpop.f32.mrf.mxu0  ;;  %v2143_v30 = vpop.f32.mrf.mxu3 }
 0x595   :  { %v2191_v53 = vadd.f32 %v2190_v19, %v2142_v55  ;;  %v2144_v16 = vadd.f32 %v2143_v30, %v3588_v39 }
 0x597   :  { %v2230_v60 = vmax.f32 %v2191_v53, 0.0 }
 0x59c   :  { %v2192_v26 = vpop.f32.mrf.mxu0  ;;  %v2146_v48 = vpop.f32.mrf.mxu3 }
 0x59d   :  { %v2193_v31 = vadd.f32 %v2192_v26, %v2144_v16  ;;  %v2147_v49 = vadd.f32 %v2146_v48, %v3588_v39 }
 0x59f   :  { %v2231_v17 = vmax.f32 %v2193_v31, 0.0 }
 0x5a1   :  { %v3006_v18 = vpack.c.bf16 %v2231_v17, %v2230_v60 }
 0x5a3   :  { %3007 = vst [vmem:[%s3633_s3] sm:$0xff] %v3006_v18  }
 0x5a4   :  { %v2195_v9 = vpop.f32.mrf.mxu0  ;;  %v2148_v33 = vpop.f32.mrf.mxu3 }
 0x5a5   :  { %v2196_v57 = vadd.f32 %v2195_v9, %v2147_v49  ;;  %v2149_v12 = vadd.f32 %v2148_v33, %v3588_v39 }
 0x5a7   :  { %v2232_v35 = vmax.f32 %v2196_v57, 0.0 }
 0x5ac   :  { %v2197_v23 = vpop.f32.mrf.mxu0  ;;  %v2151_v46 = vpop.f32.mrf.mxu3 }
 0x5ad   :  { %v2198_v28 = vadd.f32 %v2197_v23, %v2149_v12  ;;  %v2152_v61 = vadd.f32 %v2151_v46, %v3588_v39 }
 0x5af   :  { %v2233_v52 = vmax.f32 %v2198_v28, 0.0 }
 0x5b1   :  { %v3011_v42 = vpack.c.bf16 %v2233_v52, %v2232_v35 }
 0x5b3   :  { %3043 = vst [vmem:[%s3633_s3 + $0x8] sm:$0xff] %v3011_v42  }
 0x5b4   :  { %v2200_v3 = vpop.f32.mrf.mxu0  ;;  %v2153_v0 = vpop.f32.mrf.mxu3 }
 0x5b5   :  { %v2201_v1 = vadd.f32 %v2200_v3, %v2152_v61  ;;  %v2154_v10 = vadd.f32 %v2153_v0, %v3588_v39 }
 0x5b7   :  { %v2234_v22 = vmax.f32 %v2201_v1, 0.0 }
 0x5bc   :  { %v2202_v40 = vpop.f32.mrf.mxu0  ;;  %v2156_v45 = vpop.f32.mrf.mxu3 }
 0x5bd   :  { %v2203_v58 = vadd.f32 %v2202_v40, %v2154_v10  ;;  %v2157_v32 = vadd.f32 %v2156_v45, %v3588_v39 }
 0x5bf   :  { %v2235_v36 = vmax.f32 %v2203_v58, 0.0 }
 0x5c1   :  { %v3016_v21 = vpack.c.bf16 %v2235_v36, %v2234_v22 }
 0x5c3   :  { %3044 = vst [vmem:[%s3633_s3 + $0x10] sm:$0xff] %v3016_v21  }
 0x5c4   :  { %v2205_v7 = vpop.f32.mrf.mxu0  ;;  %v2158_v13 = vpop.f32.mrf.mxu3 }
 0x5c5   :  { %v2206_v43 = vadd.f32 %v2205_v7, %v2157_v32  ;;  %v2159_v24 = vadd.f32 %v2158_v13, %v3588_v39 }
 0x5c7   :  { %v2236_v41 = vmax.f32 %v2206_v43, 0.0 }
 0x5cc   :  { %v2207_v37 = vpop.f32.mrf.mxu0  ;;  %v2161_v44 = vpop.f32.mrf.mxu3 }
 0x5cd   :  { %v2208_v20 = vadd.f32 %v2207_v37, %v2159_v24  ;;  %v2162_v29 = vadd.f32 %v2161_v44, %v3588_v39 }
 0x5cf   :  { %v2237_v34 = vmax.f32 %v2208_v20, 0.0 }
 0x5d1   :  { %v3021_v4 = vpack.c.bf16 %v2237_v34, %v2236_v41 }
 0x5d3   :  { %3045 = vst [vmem:[%s3633_s3 + $0x18] sm:$0xff] %v3021_v4  }
 0x5d4   :  { %v2210_v38 = vpop.f32.mrf.mxu0  ;;  %v2163_v2 = vpop.f32.mrf.mxu3 }
 0x5d5   :  { %v2211_v5 = vadd.f32 %v2210_v38, %v2162_v29  ;;  %v2164_v14 = vadd.f32 %v2163_v2, %v3588_v39 }
 0x5d7   :  { %v2238_v51 = vmax.f32 %v2211_v5, 0.0 }
 0x5dc   :  { %v2212_v50 = vpop.f32.mrf.mxu0  ;;  %v2166_v8 = vpop.f32.mrf.mxu3 }
 0x5dd   :  { %v2213_v62 = vadd.f32 %v2212_v50, %v2164_v14  ;;  %v2167_v25 = vadd.f32 %v2166_v8, %v3588_v39 }
 0x5df   :  { %v2239_v6 = vmax.f32 %v2213_v62, 0.0 }
 0x5e1   :  { %v3026_v11 = vpack.c.bf16 %v2239_v6, %v2238_v51 }
 0x5e3   :  { %3046 = vst [vmem:[%s3633_s3 + $0x20] sm:$0xff] %v3026_v11  }
 0x5e4   :  { %v2215_v59 = vpop.f32.mrf.mxu0  ;;  %v2168_v15 = vpop.f32.mrf.mxu3 }
 0x5e5   :  { %v2216_v27 = vadd.f32 %v2215_v59, %v2167_v25  ;;  %v2169_v56 = vadd.f32 %v2168_v15, %v3588_v39 }
 0x5e7   :  { %v2240_v19 = vmax.f32 %v2216_v27, 0.0 }
 0x5ec   :  { %v2217_v54 = vpop.f32.mrf.mxu0  ;;  %v2171_v63 = vpop.f32.mrf.mxu3 }
 0x5ed   :  { %v2218_v47 = vadd.f32 %v2217_v54, %v2169_v56  ;;  %v2172_v26 = vadd.f32 %v2171_v63, %v3588_v39 }
 0x5ef   :  { %v2241_v30 = vmax.f32 %v2218_v47, 0.0 }
 0x5f1   :  { %v3031_v55 = vpack.c.bf16 %v2241_v30, %v2240_v19 }
 0x5f3   :  { %3047 = vst [vmem:[%s3633_s3 + $0x28] sm:$0xff] %v3031_v55  }
 0x5f4   :  { %v2220_v53 = vpop.f32.mrf.mxu0  ;;  %v2173_v16 = vpop.f32.mrf.mxu3 }
 0x5f5   :  { %v2221_v48 = vadd.f32 %v2220_v53, %v2172_v26  ;;  %v2174_v31 = vadd.f32 %v2173_v16, %v3588_v39 }
 0x5f7   :  { %v2242_v9 = vmax.f32 %v2221_v48, 0.0 }
 0x5fc   :  { %v2222_v60 = vpop.f32.mrf.mxu0  ;;  %v2176_v18 = vpop.f32.mrf.mxu3 }
 0x5fd   :  { %v2223_v17 = vadd.f32 %v2222_v60, %v2174_v31  ;;  %v2177_v23 = vadd.f32 %v2176_v18, %v3588_v39 }
 0x5ff   :  { %v2243_v33 = vmax.f32 %v2223_v17, 0.0 }
 0x601   :  { %v3036_v49 = vpack.c.bf16 %v2243_v33, %v2242_v9 }
 0x603   :  { %3048 = vst [vmem:[%s3633_s3 + $0x30] sm:$0xff] %v3036_v49  }
 0x604   :  { %v2225_v57 = vpop.f32.mrf.mxu0  ;;  %v2178_v12 = vpop.f32.mrf.mxu3 }
 0x605   :  { %v2226_v46 = vadd.f32 %v2225_v57, %v2177_v23  ;;  %v2179_v28 = vadd.f32 %v2178_v12, %v3588_v39 }
 0x607   :  { %v2244_v42 = vmax.f32 %v2226_v46, 0.0 }
 0x60c   :  { %v2227_v35 = vpop.f32.mrf.mxu0 }
 0x60d   :  { %v2228_v52 = vadd.f32 %v2227_v35, %v2179_v28 }
 0x60f   :  { %v2245_v3 = vmax.f32 %v2228_v52, 0.0 }
 0x611   :  { %v3041_v0 = vpack.c.bf16 %v2245_v3, %v2244_v42 }
 0x613   :  { %3049 = vst [vmem:[%s3633_s3 + $0x38] sm:$0xff] %v3041_v0  }
 0x614   :  { %2282 = vsyncpa [#allocation3], 1 }

</bundles_post_ra>
